<compile_context>
chip_gen: v6e
topology: v6e:2x2x1
jax: 0.10.0
libtpu: 0.0.40
codegen_flags: <defaults>
</compile_context>

<pallas_src>
import jax
import jax.numpy as jnp
from jax import lax
from jax.experimental import pallas as pl
from jax.experimental.pallas import tpu as pltpu

LN_EPS = 1e-5


def _layer_norm(v, gamma, beta):
    mu = jnp.mean(v, axis=-1, keepdims=True)
    d = v - mu
    var = jnp.mean(d * d, axis=-1, keepdims=True)
    return d * lax.rsqrt(var + LN_EPS) * gamma + beta


def _attend(q, k, v):
    # scores = q @ k.T  (no 1/sqrt(d) scaling, matching the reference module)
    s = lax.dot_general(q, k, (((1,), (1,)), ((), ())),
                        preferred_element_type=jnp.float32)
    m = jnp.max(s, axis=-1, keepdims=True)
    p = jnp.exp(s - m)
    p = p / jnp.sum(p, axis=-1, keepdims=True)
    return jnp.dot(p, v, preferred_element_type=jnp.float32)


def _spatial_transformer_kernel(
    x_ref, ctx_ref,
    wq_s_ref, wk_s_ref, wv_s_ref,
    wq_c_ref, wk_c_ref, wv_c_ref,
    g1_ref, b1_ref, g2_ref, b2_ref, g3_ref, b3_ref,
    w1_ref, bf1_ref, w2_ref, bf2_ref,
    out_ref,
):
    x0 = x_ref[0].astype(jnp.float32)      # (T, C) tokens of this batch element
    ctx = ctx_ref[0].astype(jnp.float32)   # (S, Dc) context of this batch element

    x = x0

    # --- self attention (pre-norm + residual) ---
    h1 = _layer_norm(x, g1_ref[...], b1_ref[...])
    q = jnp.dot(h1, wq_s_ref[...], preferred_element_type=jnp.float32)
    k = jnp.dot(h1, wk_s_ref[...], preferred_element_type=jnp.float32)
    v = jnp.dot(h1, wv_s_ref[...], preferred_element_type=jnp.float32)
    x = x + _attend(q, k, v)

    # --- cross attention (pre-norm + residual) ---
    h2 = _layer_norm(x, g2_ref[...], b2_ref[...])
    q2 = jnp.dot(h2, wq_c_ref[...], preferred_element_type=jnp.float32)
    k2 = jnp.dot(ctx, wk_c_ref[...], preferred_element_type=jnp.float32)
    v2 = jnp.dot(ctx, wv_c_ref[...], preferred_element_type=jnp.float32)
    x = x + _attend(q2, k2, v2)

    # --- feed-forward (pre-norm + residual) ---
    h3 = _layer_norm(x, g3_ref[...], b3_ref[...])
    f = jnp.dot(h3, w1_ref[...], preferred_element_type=jnp.float32) + bf1_ref[...]
    # TODO(synk): PyTorch nn.GELU() is exact (erf); tanh-approx GELU is used
    # here since erf lowering is not guaranteed in Mosaic (max diff ~1e-3).
    f = jax.nn.gelu(f, approximate=True)
    f = jnp.dot(f, w2_ref[...], preferred_element_type=jnp.float32) + bf2_ref[...]
    x = x + f

    # SpatialTransformer's outer residual (x_in) folded in here (same layout).
    out_ref[0] = (x + x0).astype(out_ref.dtype)


def spatial_transformer_forward(x, context, params):
    """Pallas implementation of SpatialTransformer.forward.

    x:       (B, C, H, W) float32, with hidden_dim == C
    context: (B, S, context_dim) float32
    params:  dict of TransformerBlock parameters (PyTorch layouts)
    returns: (B, C, H, W) float32
    """
    b, c, h, w = x.shape
    t = h * w
    s, dc = context.shape[1], context.shape[2]

    # rearrange 'b c h w -> b (h w) c'
    tokens = jnp.transpose(x, (0, 2, 3, 1)).reshape(b, t, c)

    def vec2(p):  # (d,) -> (1, d) for clean 2-D VMEM blocks
        return p.reshape(1, -1)

    operands = (
        tokens,
        context,
        # Linear weights pre-transposed to (in, out) so the kernel does plain
        # row-major matmuls on the MXU.
        params["wq_self"].T, params["wk_self"].T, params["wv_self"].T,
        params["wq_cross"].T, params["wk_cross"].T, params["wv_cross"].T,
        vec2(params["ln1_g"]), vec2(params["ln1_b"]),
        vec2(params["ln2_g"]), vec2(params["ln2_b"]),
        vec2(params["ln3_g"]), vec2(params["ln3_b"]),
        params["w_ffn1"].T, vec2(params["b_ffn1"]),
        params["w_ffn2"].T, vec2(params["b_ffn2"]),
    )

    batch_map = lambda i: (i, 0, 0)
    const_map = lambda i: (0, 0)   # weights: same (resident) block every step

    in_specs = [
        pl.BlockSpec((1, t, c), batch_map),
        pl.BlockSpec((1, s, dc), batch_map),
    ] + [pl.BlockSpec(op.shape, const_map) for op in operands[2:]]

    out_tokens = pl.pallas_call(
        _spatial_transformer_kernel,
        out_shape=jax.ShapeDtypeStruct((b, t, c), x.dtype),
        grid_spec=pltpu.PrefetchScalarGridSpec(
            num_scalar_prefetch=0,
            grid=(b,),
            in_specs=in_specs,
            out_specs=pl.BlockSpec((1, t, c), batch_map),
        ),
        compiler_params=pltpu.CompilerParams(
            dimension_semantics=("parallel",)),
    )(*operands)

    # rearrange 'b (h w) c -> b c h w'
    return jnp.transpose(out_tokens.reshape(b, h, w, c), (0, 3, 1, 2))


def reference_forward(x, context, params):
    """Pure-JAX reference mirroring the PyTorch SpatialTransformer forward."""
    b, c, h, w = x.shape
    tokens = jnp.transpose(x, (0, 2, 3, 1)).reshape(b, h * w, c)

    def ln(v, g, bias):
        mu = v.mean(-1, keepdims=True)
        var = ((v - mu) ** 2).mean(-1, keepdims=True)
        return (v - mu) / jnp.sqrt(var + LN_EPS) * g + bias

    def attn(q, k, v):
        scores = jnp.einsum("btd,bsd->bts", q, k)
        a = jax.nn.softmax(scores, axis=-1)
        return jnp.einsum("bts,bsh->bth", a, v)

    xt = tokens
    h1 = ln(xt, params["ln1_g"], params["ln1_b"])
    xt = xt + attn(h1 @ params["wq_self"].T,
                   h1 @ params["wk_self"].T,
                   h1 @ params["wv_self"].T)
    h2 = ln(xt, params["ln2_g"], params["ln2_b"])
    xt = xt + attn(h2 @ params["wq_cross"].T,
                   context @ params["wk_cross"].T,
                   context @ params["wv_cross"].T)
    h3 = ln(xt, params["ln3_g"], params["ln3_b"])
    f = jax.nn.gelu(h3 @ params["w_ffn1"].T + params["b_ffn1"],
                    approximate=True)
    xt = xt + f @ params["w_ffn2"].T + params["b_ffn2"]
    out_tok = xt + tokens
    return jnp.transpose(out_tok.reshape(b, h, w, c), (0, 3, 1, 2))


if __name__ == "__main__":
    # Small shapes consistent with the module: hidden_dim == channels.
    batch, hidden, height, width = 2, 32, 8, 8     # tokens T = 64
    context_seq, context_dim = 8, 16

    key = jax.random.PRNGKey(0)
    keys = jax.random.split(key, 20)

    def randn(k, shape, scale=1.0):
        return scale * jax.random.normal(k, shape, dtype=jnp.float32)

    x = randn(keys[0], (batch, hidden, height, width))
    context = randn(keys[1], (batch, context_seq, context_dim))

    wscale = 0.2
    params = {
        # CrossAttention (self): Linear(hidden, hidden, bias=False) weights (out, in)
        "wq_self": randn(keys[2], (hidden, hidden), wscale),
        "wk_self": randn(keys[3], (hidden, hidden), wscale),
        "wv_self": randn(keys[4], (hidden, hidden), wscale),
        # CrossAttention (cross): query from hidden, key/value from context_dim
        "wq_cross": randn(keys[5], (hidden, hidden), wscale),
        "wk_cross": randn(keys[6], (hidden, context_dim), wscale),
        "wv_cross": randn(keys[7], (hidden, context_dim), wscale),
        # LayerNorms
        "ln1_g": 1.0 + randn(keys[8], (hidden,), 0.1),
        "ln1_b": randn(keys[9], (hidden,), 0.1),
        "ln2_g": 1.0 + randn(keys[10], (hidden,), 0.1),
        "ln2_b": randn(keys[11], (hidden,), 0.1),
        "ln3_g": 1.0 + randn(keys[12], (hidden,), 0.1),
        "ln3_b": randn(keys[13], (hidden,), 0.1),
        # FFN: Linear(hidden, 3*hidden) -> GELU -> Linear(3*hidden, hidden)
        "w_ffn1": randn(keys[14], (3 * hidden, hidden), wscale),
        "b_ffn1": randn(keys[15], (3 * hidden,), 0.1),
        "w_ffn2": randn(keys[16], (hidden, 3 * hidden), wscale),
        "b_ffn2": randn(keys[17], (hidden,), 0.1),
    }

    out = spatial_transformer_forward(x, context, params)
    out = jax.block_until_ready(out)

    with jax.default_matmul_precision("highest"):
        ref = reference_forward(x, context, params)
    ref = jax.block_until_ready(ref)

    assert out.shape == x.shape, (out.shape, x.shape)
    max_err = float(jnp.max(jnp.abs(out - ref)))
    assert jnp.allclose(out, ref, atol=2e-4, rtol=2e-4), f"max_err={max_err}"

    print("KERNEL_OK")
</pallas_src>

<mosaic_0001>
module attributes {stable_mosaic.version = 11 : i64} {
  func.func @_spatial_transformer_kernel(%arg0: i32, %arg1: memref<1x64x32xf32, #tpu.memory_space<vmem>>, %arg2: memref<1x8x16xf32, #tpu.memory_space<vmem>>, %arg3: memref<32x32xf32, #tpu.memory_space<vmem>>, %arg4: memref<32x32xf32, #tpu.memory_space<vmem>>, %arg5: memref<32x32xf32, #tpu.memory_space<vmem>>, %arg6: memref<32x32xf32, #tpu.memory_space<vmem>>, %arg7: memref<16x32xf32, #tpu.memory_space<vmem>>, %arg8: memref<16x32xf32, #tpu.memory_space<vmem>>, %arg9: memref<1x32xf32, #tpu.memory_space<vmem>>, %arg10: memref<1x32xf32, #tpu.memory_space<vmem>>, %arg11: memref<1x32xf32, #tpu.memory_space<vmem>>, %arg12: memref<1x32xf32, #tpu.memory_space<vmem>>, %arg13: memref<1x32xf32, #tpu.memory_space<vmem>>, %arg14: memref<1x32xf32, #tpu.memory_space<vmem>>, %arg15: memref<32x96xf32, #tpu.memory_space<vmem>>, %arg16: memref<1x96xf32, #tpu.memory_space<vmem>>, %arg17: memref<96x32xf32, #tpu.memory_space<vmem>>, %arg18: memref<1x32xf32, #tpu.memory_space<vmem>>, %arg19: memref<1x64x32xf32, #tpu.memory_space<vmem>>) attributes {dimension_semantics = [#tpu.dimension_semantics<parallel>], iteration_bounds = array<i64: 2>, scalar_prefetch = 0 : i64, scratch_operands = 0 : i64, tpu.core_type = #tpu.core_type<tc>, window_params = [{transform_indices = @transform_0, window_bounds = array<i64: 1, 64, 32>}, {transform_indices = @transform_1, window_bounds = array<i64: 1, 8, 16>}, {pipeline_mode = #tpu.pipeline_mode<synchronous>, transform_indices = @transform_2, window_bounds = array<i64: 32, 32>}, {pipeline_mode = #tpu.pipeline_mode<synchronous>, transform_indices = @transform_3, window_bounds = array<i64: 32, 32>}, {pipeline_mode = #tpu.pipeline_mode<synchronous>, transform_indices = @transform_4, window_bounds = array<i64: 32, 32>}, {pipeline_mode = #tpu.pipeline_mode<synchronous>, transform_indices = @transform_5, window_bounds = array<i64: 32, 32>}, {pipeline_mode = #tpu.pipeline_mode<synchronous>, transform_indices = @transform_6, window_bounds = array<i64: 16, 32>}, {pipeline_mode = #tpu.pipeline_mode<synchronous>, transform_indices = @transform_7, window_bounds = array<i64: 16, 32>}, {pipeline_mode = #tpu.pipeline_mode<synchronous>, transform_indices = @transform_8, window_bounds = array<i64: 1, 32>}, {pipeline_mode = #tpu.pipeline_mode<synchronous>, transform_indices = @transform_9, window_bounds = array<i64: 1, 32>}, {pipeline_mode = #tpu.pipeline_mode<synchronous>, transform_indices = @transform_10, window_bounds = array<i64: 1, 32>}, {pipeline_mode = #tpu.pipeline_mode<synchronous>, transform_indices = @transform_11, window_bounds = array<i64: 1, 32>}, {pipeline_mode = #tpu.pipeline_mode<synchronous>, transform_indices = @transform_12, window_bounds = array<i64: 1, 32>}, {pipeline_mode = #tpu.pipeline_mode<synchronous>, transform_indices = @transform_13, window_bounds = array<i64: 1, 32>}, {pipeline_mode = #tpu.pipeline_mode<synchronous>, transform_indices = @transform_14, window_bounds = array<i64: 32, 96>}, {pipeline_mode = #tpu.pipeline_mode<synchronous>, transform_indices = @transform_15, window_bounds = array<i64: 1, 96>}, {pipeline_mode = #tpu.pipeline_mode<synchronous>, transform_indices = @transform_16, window_bounds = array<i64: 96, 32>}, {pipeline_mode = #tpu.pipeline_mode<synchronous>, transform_indices = @transform_17, window_bounds = array<i64: 1, 32>}, {transform_indices = @transform_18, window_bounds = array<i64: 1, 64, 32>}]} {
    %c0 = arith.constant 0 : index
    %c0_0 = arith.constant 0 : index
    %c0_1 = arith.constant 0 : index
    %0 = vector.load %arg1[%c0, %c0_0, %c0_1] : memref<1x64x32xf32, #tpu.memory_space<vmem>>, vector<1x64x32xf32>
    %1 = vector.shape_cast %0 : vector<1x64x32xf32> to vector<64x32xf32>
    %c0_2 = arith.constant 0 : index
    %c0_3 = arith.constant 0 : index
    %c0_4 = arith.constant 0 : index
    %2 = vector.load %arg2[%c0_2, %c0_3, %c0_4] : memref<1x8x16xf32, #tpu.memory_space<vmem>>, vector<1x8x16xf32>
    %3 = vector.shape_cast %2 : vector<1x8x16xf32> to vector<8x16xf32>
    %c0_5 = arith.constant 0 : index
    %c0_6 = arith.constant 0 : index
    %4 = vector.load %arg9[%c0_5, %c0_6] : memref<1x32xf32, #tpu.memory_space<vmem>>, vector<1x32xf32>
    %c0_7 = arith.constant 0 : index
    %c0_8 = arith.constant 0 : index
    %5 = vector.load %arg10[%c0_7, %c0_8] : memref<1x32xf32, #tpu.memory_space<vmem>>, vector<1x32xf32>
    %cst = arith.constant dense<0.000000e+00> : vector<64xf32>
    %6 = vector.multi_reduction <add>, %1, %cst [1] : vector<64x32xf32> to vector<64xf32>
    %7 = vector.shape_cast %6 : vector<64xf32> to vector<64x1xf32>
    %cst_9 = arith.constant 3.200000e+01 : f32
    %8 = vector.broadcast %cst_9 : f32 to vector<64x1xf32>
    %9 = arith.divf %7, %8 : vector<64x1xf32>
    %10 = vector.broadcast %9 : vector<64x1xf32> to vector<64x32xf32>
    %11 = arith.subf %1, %10 : vector<64x32xf32>
    %12 = arith.mulf %11, %11 : vector<64x32xf32>
    %cst_10 = arith.constant dense<0.000000e+00> : vector<64xf32>
    %13 = vector.multi_reduction <add>, %12, %cst_10 [1] : vector<64x32xf32> to vector<64xf32>
    %14 = vector.shape_cast %13 : vector<64xf32> to vector<64x1xf32>
    %cst_11 = arith.constant 3.200000e+01 : f32
    %15 = vector.broadcast %cst_11 : f32 to vector<64x1xf32>
    %16 = arith.divf %14, %15 : vector<64x1xf32>
    %cst_12 = arith.constant 9.99999974E-6 : f32
    %17 = vector.broadcast %cst_12 : f32 to vector<64x1xf32>
    %18 = arith.addf %16, %17 : vector<64x1xf32>
    %19 = math.rsqrt %18 : vector<64x1xf32>
    %20 = vector.broadcast %19 : vector<64x1xf32> to vector<64x32xf32>
    %21 = arith.mulf %11, %20 : vector<64x32xf32>
    %22 = vector.broadcast %4 : vector<1x32xf32> to vector<64x32xf32>
    %23 = arith.mulf %21, %22 : vector<64x32xf32>
    %24 = vector.broadcast %5 : vector<1x32xf32> to vector<64x32xf32>
    %25 = arith.addf %23, %24 : vector<64x32xf32>
    %c0_13 = arith.constant 0 : index
    %c0_14 = arith.constant 0 : index
    %26 = vector.load %arg3[%c0_13, %c0_14] : memref<32x32xf32, #tpu.memory_space<vmem>>, vector<32x32xf32>
    %cst_15 = arith.constant dense<0.000000e+00> : vector<64x32xf32>
    %27 = tpu.matmul %25, %26, %cst_15 {dimension_numbers = #tpu.dot_dimension_numbers<[1], [0], [0], [1], [0, 0, 1, 1], [], []>} : vector<64x32xf32>, vector<32x32xf32>, vector<64x32xf32> -> vector<64x32xf32>
    %c0_16 = arith.constant 0 : index
    %c0_17 = arith.constant 0 : index
    %28 = vector.load %arg4[%c0_16, %c0_17] : memref<32x32xf32, #tpu.memory_space<vmem>>, vector<32x32xf32>
    %cst_18 = arith.constant dense<0.000000e+00> : vector<64x32xf32>
    %29 = tpu.matmul %25, %28, %cst_18 {dimension_numbers = #tpu.dot_dimension_numbers<[1], [0], [0], [1], [0, 0, 1, 1], [], []>} : vector<64x32xf32>, vector<32x32xf32>, vector<64x32xf32> -> vector<64x32xf32>
    %c0_19 = arith.constant 0 : index
    %c0_20 = arith.constant 0 : index
    %30 = vector.load %arg5[%c0_19, %c0_20] : memref<32x32xf32, #tpu.memory_space<vmem>>, vector<32x32xf32>
    %cst_21 = arith.constant dense<0.000000e+00> : vector<64x32xf32>
    %31 = tpu.matmul %25, %30, %cst_21 {dimension_numbers = #tpu.dot_dimension_numbers<[1], [0], [0], [1], [0, 0, 1, 1], [], []>} : vector<64x32xf32>, vector<32x32xf32>, vector<64x32xf32> -> vector<64x32xf32>
    %cst_22 = arith.constant dense<0.000000e+00> : vector<64x64xf32>
    %32 = tpu.matmul %27, %29, %cst_22 {dimension_numbers = #tpu.dot_dimension_numbers<[1], [1], [0], [0], [0, 0, 1, 0], [], []>} : vector<64x32xf32>, vector<64x32xf32>, vector<64x64xf32> -> vector<64x64xf32>
    %cst_23 = arith.constant dense<0xFF800000> : vector<64xf32>
    %33 = vector.multi_reduction <maximumf>, %32, %cst_23 [1] : vector<64x64xf32> to vector<64xf32>
    %34 = vector.shape_cast %33 : vector<64xf32> to vector<64x1xf32>
    %35 = vector.broadcast %34 : vector<64x1xf32> to vector<64x64xf32>
    %36 = arith.subf %32, %35 : vector<64x64xf32>
    %37 = math.exp %36 : vector<64x64xf32>
    %cst_24 = arith.constant dense<0.000000e+00> : vector<64xf32>
    %38 = vector.multi_reduction <add>, %37, %cst_24 [1] : vector<64x64xf32> to vector<64xf32>
    %39 = vector.shape_cast %38 : vector<64xf32> to vector<64x1xf32>
    %40 = vector.broadcast %39 : vector<64x1xf32> to vector<64x64xf32>
    %41 = arith.divf %37, %40 : vector<64x64xf32>
    %cst_25 = arith.constant dense<0.000000e+00> : vector<64x32xf32>
    %42 = tpu.matmul %41, %31, %cst_25 {dimension_numbers = #tpu.dot_dimension_numbers<[1], [0], [0], [1], [0, 0, 1, 1], [], []>} : vector<64x64xf32>, vector<64x32xf32>, vector<64x32xf32> -> vector<64x32xf32>
    %43 = arith.addf %1, %42 : vector<64x32xf32>
    %c0_26 = arith.constant 0 : index
    %c0_27 = arith.constant 0 : index
    %44 = vector.load %arg11[%c0_26, %c0_27] : memref<1x32xf32, #tpu.memory_space<vmem>>, vector<1x32xf32>
    %c0_28 = arith.constant 0 : index
    %c0_29 = arith.constant 0 : index
    %45 = vector.load %arg12[%c0_28, %c0_29] : memref<1x32xf32, #tpu.memory_space<vmem>>, vector<1x32xf32>
    %cst_30 = arith.constant dense<0.000000e+00> : vector<64xf32>
    %46 = vector.multi_reduction <add>, %43, %cst_30 [1] : vector<64x32xf32> to vector<64xf32>
    %47 = vector.shape_cast %46 : vector<64xf32> to vector<64x1xf32>
    %cst_31 = arith.constant 3.200000e+01 : f32
    %48 = vector.broadcast %cst_31 : f32 to vector<64x1xf32>
    %49 = arith.divf %47, %48 : vector<64x1xf32>
    %50 = vector.broadcast %49 : vector<64x1xf32> to vector<64x32xf32>
    %51 = arith.subf %43, %50 : vector<64x32xf32>
    %52 = arith.mulf %51, %51 : vector<64x32xf32>
    %cst_32 = arith.constant dense<0.000000e+00> : vector<64xf32>
    %53 = vector.multi_reduction <add>, %52, %cst_32 [1] : vector<64x32xf32> to vector<64xf32>
    %54 = vector.shape_cast %53 : vector<64xf32> to vector<64x1xf32>
    %cst_33 = arith.constant 3.200000e+01 : f32
    %55 = vector.broadcast %cst_33 : f32 to vector<64x1xf32>
    %56 = arith.divf %54, %55 : vector<64x1xf32>
    %cst_34 = arith.constant 9.99999974E-6 : f32
    %57 = vector.broadcast %cst_34 : f32 to vector<64x1xf32>
    %58 = arith.addf %56, %57 : vector<64x1xf32>
    %59 = math.rsqrt %58 : vector<64x1xf32>
    %60 = vector.broadcast %59 : vector<64x1xf32> to vector<64x32xf32>
    %61 = arith.mulf %51, %60 : vector<64x32xf32>
    %62 = vector.broadcast %44 : vector<1x32xf32> to vector<64x32xf32>
    %63 = arith.mulf %61, %62 : vector<64x32xf32>
    %64 = vector.broadcast %45 : vector<1x32xf32> to vector<64x32xf32>
    %65 = arith.addf %63, %64 : vector<64x32xf32>
    %c0_35 = arith.constant 0 : index
    %c0_36 = arith.constant 0 : index
    %66 = vector.load %arg6[%c0_35, %c0_36] : memref<32x32xf32, #tpu.memory_space<vmem>>, vector<32x32xf32>
    %cst_37 = arith.constant dense<0.000000e+00> : vector<64x32xf32>
    %67 = tpu.matmul %65, %66, %cst_37 {dimension_numbers = #tpu.dot_dimension_numbers<[1], [0], [0], [1], [0, 0, 1, 1], [], []>} : vector<64x32xf32>, vector<32x32xf32>, vector<64x32xf32> -> vector<64x32xf32>
    %c0_38 = arith.constant 0 : index
    %c0_39 = arith.constant 0 : index
    %68 = vector.load %arg7[%c0_38, %c0_39] : memref<16x32xf32, #tpu.memory_space<vmem>>, vector<16x32xf32>
    %cst_40 = arith.constant dense<0.000000e+00> : vector<8x32xf32>
    %69 = tpu.matmul %3, %68, %cst_40 {dimension_numbers = #tpu.dot_dimension_numbers<[1], [0], [0], [1], [0, 0, 1, 1], [], []>} : vector<8x16xf32>, vector<16x32xf32>, vector<8x32xf32> -> vector<8x32xf32>
    %c0_41 = arith.constant 0 : index
    %c0_42 = arith.constant 0 : index
    %70 = vector.load %arg8[%c0_41, %c0_42] : memref<16x32xf32, #tpu.memory_space<vmem>>, vector<16x32xf32>
    %cst_43 = arith.constant dense<0.000000e+00> : vector<8x32xf32>
    %71 = tpu.matmul %3, %70, %cst_43 {dimension_numbers = #tpu.dot_dimension_numbers<[1], [0], [0], [1], [0, 0, 1, 1], [], []>} : vector<8x16xf32>, vector<16x32xf32>, vector<8x32xf32> -> vector<8x32xf32>
    %cst_44 = arith.constant dense<0.000000e+00> : vector<64x8xf32>
    %72 = tpu.matmul %67, %69, %cst_44 {dimension_numbers = #tpu.dot_dimension_numbers<[1], [1], [0], [0], [0, 0, 1, 0], [], []>} : vector<64x32xf32>, vector<8x32xf32>, vector<64x8xf32> -> vector<64x8xf32>
    %cst_45 = arith.constant dense<0xFF800000> : vector<64xf32>
    %73 = vector.multi_reduction <maximumf>, %72, %cst_45 [1] : vector<64x8xf32> to vector<64xf32>
    %74 = vector.shape_cast %73 : vector<64xf32> to vector<64x1xf32>
    %75 = vector.broadcast %74 : vector<64x1xf32> to vector<64x8xf32>
    %76 = arith.subf %72, %75 : vector<64x8xf32>
    %77 = math.exp %76 : vector<64x8xf32>
    %cst_46 = arith.constant dense<0.000000e+00> : vector<64xf32>
    %78 = vector.multi_reduction <add>, %77, %cst_46 [1] : vector<64x8xf32> to vector<64xf32>
    %79 = vector.shape_cast %78 : vector<64xf32> to vector<64x1xf32>
    %80 = vector.broadcast %79 : vector<64x1xf32> to vector<64x8xf32>
    %81 = arith.divf %77, %80 : vector<64x8xf32>
    %cst_47 = arith.constant dense<0.000000e+00> : vector<64x32xf32>
    %82 = tpu.matmul %81, %71, %cst_47 {dimension_numbers = #tpu.dot_dimension_numbers<[1], [0], [0], [1], [0, 0, 1, 1], [], []>} : vector<64x8xf32>, vector<8x32xf32>, vector<64x32xf32> -> vector<64x32xf32>
    %83 = arith.addf %43, %82 : vector<64x32xf32>
    %c0_48 = arith.constant 0 : index
    %c0_49 = arith.constant 0 : index
    %84 = vector.load %arg13[%c0_48, %c0_49] : memref<1x32xf32, #tpu.memory_space<vmem>>, vector<1x32xf32>
    %c0_50 = arith.constant 0 : index
    %c0_51 = arith.constant 0 : index
    %85 = vector.load %arg14[%c0_50, %c0_51] : memref<1x32xf32, #tpu.memory_space<vmem>>, vector<1x32xf32>
    %cst_52 = arith.constant dense<0.000000e+00> : vector<64xf32>
    %86 = vector.multi_reduction <add>, %83, %cst_52 [1] : vector<64x32xf32> to vector<64xf32>
    %87 = vector.shape_cast %86 : vector<64xf32> to vector<64x1xf32>
    %cst_53 = arith.constant 3.200000e+01 : f32
    %88 = vector.broadcast %cst_53 : f32 to vector<64x1xf32>
    %89 = arith.divf %87, %88 : vector<64x1xf32>
    %90 = vector.broadcast %89 : vector<64x1xf32> to vector<64x32xf32>
    %91 = arith.subf %83, %90 : vector<64x32xf32>
    %92 = arith.mulf %91, %91 : vector<64x32xf32>
    %cst_54 = arith.constant dense<0.000000e+00> : vector<64xf32>
    %93 = vector.multi_reduction <add>, %92, %cst_54 [1] : vector<64x32xf32> to vector<64xf32>
    %94 = vector.shape_cast %93 : vector<64xf32> to vector<64x1xf32>
    %cst_55 = arith.constant 3.200000e+01 : f32
    %95 = vector.broadcast %cst_55 : f32 to vector<64x1xf32>
    %96 = arith.divf %94, %95 : vector<64x1xf32>
    %cst_56 = arith.constant 9.99999974E-6 : f32
    %97 = vector.broadcast %cst_56 : f32 to vector<64x1xf32>
    %98 = arith.addf %96, %97 : vector<64x1xf32>
    %99 = math.rsqrt %98 : vector<64x1xf32>
    %100 = vector.broadcast %99 : vector<64x1xf32> to vector<64x32xf32>
    %101 = arith.mulf %91, %100 : vector<64x32xf32>
    %102 = vector.broadcast %84 : vector<1x32xf32> to vector<64x32xf32>
    %103 = arith.mulf %101, %102 : vector<64x32xf32>
    %104 = vector.broadcast %85 : vector<1x32xf32> to vector<64x32xf32>
    %105 = arith.addf %103, %104 : vector<64x32xf32>
    %c0_57 = arith.constant 0 : index
    %c0_58 = arith.constant 0 : index
    %106 = vector.load %arg15[%c0_57, %c0_58] : memref<32x96xf32, #tpu.memory_space<vmem>>, vector<32x96xf32>
    %cst_59 = arith.constant dense<0.000000e+00> : vector<64x96xf32>
    %107 = tpu.matmul %105, %106, %cst_59 {dimension_numbers = #tpu.dot_dimension_numbers<[1], [0], [0], [1], [0, 0, 1, 1], [], []>} : vector<64x32xf32>, vector<32x96xf32>, vector<64x96xf32> -> vector<64x96xf32>
    %c0_60 = arith.constant 0 : index
    %c0_61 = arith.constant 0 : index
    %108 = vector.load %arg16[%c0_60, %c0_61] : memref<1x96xf32, #tpu.memory_space<vmem>>, vector<1x96xf32>
    %109 = vector.broadcast %108 : vector<1x96xf32> to vector<64x96xf32>
    %110 = arith.addf %107, %109 : vector<64x96xf32>
    %111 = arith.mulf %110, %110 : vector<64x96xf32>
    %112 = arith.mulf %110, %111 : vector<64x96xf32>
    %cst_62 = arith.constant 4.471500e-02 : f32
    %113 = vector.broadcast %cst_62 : f32 to vector<64x96xf32>
    %114 = arith.mulf %113, %112 : vector<64x96xf32>
    %115 = arith.addf %110, %114 : vector<64x96xf32>
    %cst_63 = arith.constant 0.797884583 : f32
    %116 = vector.broadcast %cst_63 : f32 to vector<64x96xf32>
    %117 = arith.mulf %116, %115 : vector<64x96xf32>
    %118 = math.tanh %117 : vector<64x96xf32>
    %cst_64 = arith.constant 1.000000e+00 : f32
    %119 = vector.broadcast %cst_64 : f32 to vector<64x96xf32>
    %120 = arith.addf %119, %118 : vector<64x96xf32>
    %cst_65 = arith.constant 5.000000e-01 : f32
    %121 = vector.broadcast %cst_65 : f32 to vector<64x96xf32>
    %122 = arith.mulf %121, %120 : vector<64x96xf32>
    %123 = arith.mulf %110, %122 : vector<64x96xf32>
    %c0_66 = arith.constant 0 : index
    %c0_67 = arith.constant 0 : index
    %124 = vector.load %arg17[%c0_66, %c0_67] : memref<96x32xf32, #tpu.memory_space<vmem>>, vector<96x32xf32>
    %cst_68 = arith.constant dense<0.000000e+00> : vector<64x32xf32>
    %125 = tpu.matmul %123, %124, %cst_68 {dimension_numbers = #tpu.dot_dimension_numbers<[1], [0], [0], [1], [0, 0, 1, 1], [], []>} : vector<64x96xf32>, vector<96x32xf32>, vector<64x32xf32> -> vector<64x32xf32>
    %c0_69 = arith.constant 0 : index
    %c0_70 = arith.constant 0 : index
    %126 = vector.load %arg18[%c0_69, %c0_70] : memref<1x32xf32, #tpu.memory_space<vmem>>, vector<1x32xf32>
    %127 = vector.broadcast %126 : vector<1x32xf32> to vector<64x32xf32>
    %128 = arith.addf %125, %127 : vector<64x32xf32>
    %129 = arith.addf %83, %128 : vector<64x32xf32>
    %130 = arith.addf %129, %1 : vector<64x32xf32>
    %c0_71 = arith.constant 0 : index
    %c0_72 = arith.constant 0 : index
    %c0_73 = arith.constant 0 : index
    %131 = vector.load %arg19[%c0_71, %c0_72, %c0_73] : memref<1x64x32xf32, #tpu.memory_space<vmem>>, vector<1x64x32xf32>
    %132 = vector.shape_cast %131 : vector<1x64x32xf32> to vector<64x32xf32>
    %133 = vector.shape_cast %130 : vector<64x32xf32> to vector<1x64x32xf32>
    tpu.vector_store %arg19[%c0_71, %c0_72, %c0_73], %133 {strides = array<i32>} : memref<1x64x32xf32, #tpu.memory_space<vmem>>, vector<1x64x32xf32>,
    return
  }
  func.func @transform_0(%arg0: i32) -> (i32, i32, i32) {
    %c0_i32 = arith.constant 0 : i32
    %c0_i32_0 = arith.constant 0 : i32
    %c0_i32_1 = arith.constant 0 : i32
    return %arg0, %c0_i32, %c0_i32_0 : i32, i32, i32
  }
  func.func @transform_1(%arg0: i32) -> (i32, i32, i32) {
    %c0_i32 = arith.constant 0 : i32
    %c0_i32_0 = arith.constant 0 : i32
    %c0_i32_1 = arith.constant 0 : i32
    return %arg0, %c0_i32, %c0_i32_0 : i32, i32, i32
  }
  func.func @transform_2(%arg0: i32) -> (i32, i32) {
    %c0_i32 = arith.constant 0 : i32
    %c0_i32_0 = arith.constant 0 : i32
    %c0_i32_1 = arith.constant 0 : i32
    return %c0_i32, %c0_i32_0 : i32, i32
  }
  func.func @transform_3(%arg0: i32) -> (i32, i32) {
    %c0_i32 = arith.constant 0 : i32
    %c0_i32_0 = arith.constant 0 : i32
    %c0_i32_1 = arith.constant 0 : i32
    return %c0_i32, %c0_i32_0 : i32, i32
  }
  func.func @transform_4(%arg0: i32) -> (i32, i32) {
    %c0_i32 = arith.constant 0 : i32
    %c0_i32_0 = arith.constant 0 : i32
    %c0_i32_1 = arith.constant 0 : i32
    return %c0_i32, %c0_i32_0 : i32, i32
  }
  func.func @transform_5(%arg0: i32) -> (i32, i32) {
    %c0_i32 = arith.constant 0 : i32
    %c0_i32_0 = arith.constant 0 : i32
    %c0_i32_1 = arith.constant 0 : i32
    return %c0_i32, %c0_i32_0 : i32, i32
  }
  func.func @transform_6(%arg0: i32) -> (i32, i32) {
    %c0_i32 = arith.constant 0 : i32
    %c0_i32_0 = arith.constant 0 : i32
    %c0_i32_1 = arith.constant 0 : i32
    return %c0_i32, %c0_i32_0 : i32, i32
  }
  func.func @transform_7(%arg0: i32) -> (i32, i32) {
    %c0_i32 = arith.constant 0 : i32
    %c0_i32_0 = arith.constant 0 : i32
    %c0_i32_1 = arith.constant 0 : i32
    return %c0_i32, %c0_i32_0 : i32, i32
  }
  func.func @transform_8(%arg0: i32) -> (i32, i32) {
    %c0_i32 = arith.constant 0 : i32
    %c0_i32_0 = arith.constant 0 : i32
    %c0_i32_1 = arith.constant 0 : i32
    return %c0_i32, %c0_i32_0 : i32, i32
  }
  func.func @transform_9(%arg0: i32) -> (i32, i32) {
    %c0_i32 = arith.constant 0 : i32
    %c0_i32_0 = arith.constant 0 : i32
    %c0_i32_1 = arith.constant 0 : i32
    return %c0_i32, %c0_i32_0 : i32, i32
  }
  func.func @transform_10(%arg0: i32) -> (i32, i32) {
    %c0_i32 = arith.constant 0 : i32
    %c0_i32_0 = arith.constant 0 : i32
    %c0_i32_1 = arith.constant 0 : i32
    return %c0_i32, %c0_i32_0 : i32, i32
  }
  func.func @transform_11(%arg0: i32) -> (i32, i32) {
    %c0_i32 = arith.constant 0 : i32
    %c0_i32_0 = arith.constant 0 : i32
    %c0_i32_1 = arith.constant 0 : i32
    return %c0_i32, %c0_i32_0 : i32, i32
  }
  func.func @transform_12(%arg0: i32) -> (i32, i32) {
    %c0_i32 = arith.constant 0 : i32
    %c0_i32_0 = arith.constant 0 : i32
    %c0_i32_1 = arith.constant 0 : i32
    return %c0_i32, %c0_i32_0 : i32, i32
  }
  func.func @transform_13(%arg0: i32) -> (i32, i32) {
    %c0_i32 = arith.constant 0 : i32
    %c0_i32_0 = arith.constant 0 : i32
    %c0_i32_1 = arith.constant 0 : i32
    return %c0_i32, %c0_i32_0 : i32, i32
  }
  func.func @transform_14(%arg0: i32) -> (i32, i32) {
    %c0_i32 = arith.constant 0 : i32
    %c0_i32_0 = arith.constant 0 : i32
    %c0_i32_1 = arith.constant 0 : i32
    return %c0_i32, %c0_i32_0 : i32, i32
  }
  func.func @transform_15(%arg0: i32) -> (i32, i32) {
    %c0_i32 = arith.constant 0 : i32
    %c0_i32_0 = arith.constant 0 : i32
    %c0_i32_1 = arith.constant 0 : i32
    return %c0_i32, %c0_i32_0 : i32, i32
  }
  func.func @transform_16(%arg0: i32) -> (i32, i32) {
    %c0_i32 = arith.constant 0 : i32
    %c0_i32_0 = arith.constant 0 : i32
    %c0_i32_1 = arith.constant 0 : i32
    return %c0_i32, %c0_i32_0 : i32, i32
  }
  func.func @transform_17(%arg0: i32) -> (i32, i32) {
    %c0_i32 = arith.constant 0 : i32
    %c0_i32_0 = arith.constant 0 : i32
    %c0_i32_1 = arith.constant 0 : i32
    return %c0_i32, %c0_i32_0 : i32, i32
  }
  func.func @transform_18(%arg0: i32) -> (i32, i32, i32) {
    %c0_i32 = arith.constant 0 : i32
    %c0_i32_0 = arith.constant 0 : i32
    %c0_i32_1 = arith.constant 0 : i32
    return %arg0, %c0_i32, %c0_i32_0 : i32, i32, i32
  }
}

</mosaic_0001>

<bundles_post_ra>
// kernel: tpu_custom_call.1
= control target key start
LH: loop header
LB: loop body
LE: loop exit
PB: predicated region body
PF: predicated region fallthrough
CT: control target
= control target key end

     0   :  { %s3569_s27 = smov 0   ;;  %s4247_s0 = inlined_call_operand.vmem [shape: f32[2,64,32], index: 0, kind: input, shape index: {}]   ;;  %s4248_s1 = inlined_call_operand.vmem [shape: f32[2,8,16], index: 1, kind: input, shape index: {}]   ;;  %s4249_s2 = inlined_call_operand.vmem [shape: f32[32,32], index: 2, kind: input, shape index: {}]   ;;  %s4250_s3 = inlined_call_operand.vmem [shape: f32[32,32], index: 3, kind: input, shape index: {}]   ;;  %s4251_s4 = inlined_call_operand.vmem [shape: f32[32,32], index: 4, kind: input, shape index: {}]   ;;  %s4252_s5 = inlined_call_operand.vmem [shape: f32[32,32], index: 5, kind: input, shape index: {}]   ;;  %s4253_s6 = inlined_call_operand.vmem [shape: f32[16,32], index: 6, kind: input, shape index: {}]   ;;  %s4254_s7 = inlined_call_operand.vmem [shape: f32[16,32], index: 7, kind: input, shape index: {}]   ;;  %s4255_s8 = inlined_call_operand.vmem [shape: f32[1,32], index: 8, kind: input, shape index: {}]   ;;  %s4256_s9 = inlined_call_operand.vmem [shape: f32[1,32], index: 9, kind: input, shape index: {}]   ;;  %s4257_s10 = inlined_call_operand.vmem [shape: f32[1,32], index: 10, kind: input, shape index: {}]   ;;  %s4258_s11 = inlined_call_operand.vmem [shape: f32[1,32], index: 11, kind: input, shape index: {}]   ;;  %s4259_s12 = inlined_call_operand.vmem [shape: f32[1,32], index: 12, kind: input, shape index: {}]   ;;  %s4260_s13 = inlined_call_operand.vmem [shape: f32[1,32], index: 13, kind: input, shape index: {}]   ;;  %s4261_s14 = inlined_call_operand.vmem [shape: f32[32,96], index: 14, kind: input, shape index: {}]   ;;  %s4262_s15 = inlined_call_operand.vmem [shape: f32[1,96], index: 15, kind: input, shape index: {}]   ;;  %s4263_s16 = inlined_call_operand.vmem [shape: f32[96,32], index: 16, kind: input, shape index: {}]   ;;  %s4264_s17 = inlined_call_operand.vmem [shape: f32[1,32], index: 17, kind: input, shape index: {}]   ;;  %s4265_s18 = inlined_call_operand.vmem [shape: f32[2,64,32], index: 18, kind: output, shape index: {}]  }
   0x1   :  { %4268 = sst [smem:[#allocation2_spill]] %s4247_s0 }
   0x2   :  { %4269 = sst [smem:[#allocation3_spill]] %s4248_s1 }
   0x3   :  { %4270 = sst [smem:[#allocation4_spill]] %s4249_s2 }
   0x4 LB: > { %s2827_s28 = sadd.s32 4294967295, %s3470_s27   ;;  %p2831_p0 = scmp.ge.s32.totalorder %s3470_s27, 1  ;;  %s3470_s27 = sphi %s3569_s27, %s28_s27  }
   0x5   : > { %p521_p1 = scmp.lt.s32.totalorder %s3470_s27, 3 }
   0x7   : > { %p522_p2 = pnand %p2831_p0, %p521_p1 }
   0x8   : > { %p579_p3 = scmp.lt.s32.totalorder (!%p522_p2), %s2827_s28, 1  ;;  %s4271_s19 = sld [smem:[#allocation2_spill]] (!%p522_p2) }
   0x9   : > { %525 = sbr.rel (%p522_p2) target bundleno = 3242 (0xcaa), region = 92  ;;  %s4272_s22 = sld [smem:[#allocation4_spill]] (!%p522_p2) }
   0xa   : > { %s4273_s0 = sld [smem:[#allocation3_spill]] (!%p522_p2) }
   0xe   : > { %s4276_s28 = smov (!%p579_p3, %s2827_s28), 1  ;;  %vm604_vm0 = vcmask 261120   ;;  %v3690_v60 = vld [vmem:[%s4250_s3 + $0x18] sm:$0xff]  ;;  %vm1242_vm1 = vcmask 523264   ;;  %vm1737_vm2 = vcmask 130048   ;;  %vm3473_vm3 = vmmov 0  }
   0xf   : > { %s4267_s29 = sshll.u32 %s4276_s28, 6  ;;  %v741_v56 = vld [vmem:[%s4272_s22 + $0x18] sm:$0xff]  ;;  %v740_v57 = vld [vmem:[%s4272_s22 + $0x10] sm:$0xff]  ;;  %v739_v58 = vld [vmem:[%s4272_s22 + $0x8] sm:$0xff]  ;;  %s2834_s24 = sshll.u32 %s4276_s28, 3  ;;  %vm2015_vm4 = vcmask 64512  }
  0x10   : > { %s3585_s1 = scalar_lea.vmem %s4271_s19, %s4267_s29  ;;  %3310 = vmatprep.subr.mxu1 %v741_v56  ;;  %3076 = vmatprep.subr.mxu0 %v741_v56  ;;  %v738_v59 = vld [vmem:[%s4272_s22] sm:$0xff]  ;;  %v3696_v61 = vld [vmem:[%s4251_s4 + $0x18] sm:$0xff]  ;;  %s587_s19 = scalar_lea.vmem %s4273_s0, %s2834_s24  ;;  %vm2606_vm5 = vcmask 785408  }
  0x11   : > { %v3588_v0 = vld [vmem:[%s3585_s1 + $0x20] sm:$0xff]  ;;  %v3591_v1 = vld [vmem:[%s3585_s1 + $0x30] sm:$0xff]  ;;  %v3594_v2 = vld [vmem:[%s3585_s1 + $0x28] sm:$0xff]  ;;  %3314 = vmatpush3.msra.mxu1 %v741_v56  ;;  %3077 = vmatpush3.msra.mxu0 %v741_v56  ;;  %s4274_s30 = sshll.u32 %s4276_s28, 6 }
  0x12   : > { %v617_v3 = vsel %vm604_vm0, %v3588_v0, 0.0  ;;  %v623_v4 = vsel %vm604_vm0, %v3591_v1, 0.0  ;;  %v3601_v5 = vld [vmem:[%s3585_s1 + $0x38] sm:$0xff]  ;;  %v620_v6 = vsel %vm604_vm0, %v3594_v2, 0.0  ;;  %v3608_v8 = vld [vmem:[%s3585_s1] sm:$0xff]  ;;  %v3611_v9 = vld [vmem:[%s3585_s1 + $0x8] sm:$0xff]  ;;  %3311 = vmatprep.subr.mxu1 %v740_v57  ;;  %3078 = vmatprep.subr.mxu0 %v740_v57  ;;  %s4211_s20 = scalar_lea.vmem %s4265_s18, %s4274_s30 }
  0x13   : > { %618 = vadd.xlane.f32.xlu0 %v617_v3  ;;  %624 = vadd.xlane.f32.xlu1 %v623_v4  ;;  %v626_v7 = vsel %vm604_vm0, %v3601_v5, 0.0  ;;  %v605_v10 = vsel %vm604_vm0, %v3608_v8, 0.0  ;;  %v608_v11 = vsel %vm604_vm0, %v3611_v9, 0.0  ;;  %v3618_v12 = vld [vmem:[%s3585_s1 + $0x10] sm:$0xff]  ;;  %v3621_v13 = vld [vmem:[%s3585_s1 + $0x18] sm:$0xff]  ;;  %v872_v56 = vld [vmem:[%s4250_s3 + $0x8] sm:$0xff] }
  0x14   : > { %v611_v14 = vsel %vm604_vm0, %v3618_v12, 0.0  ;;  %v614_v15 = vsel %vm604_vm0, %v3621_v13, 0.0  ;;  %3315 = vmatpush3.msra.mxu1 %v740_v57  ;;  %3079 = vmatpush3.msra.mxu0 %v740_v57 }
  0x15   : > { %3312 = vmatprep.subr.mxu1 %v739_v58  ;;  %3080 = vmatprep.subr.mxu0 %v739_v58 }
  0x16   : > { %3316 = vmatpush3.msra.mxu1 %v739_v58  ;;  %3081 = vmatpush3.msra.mxu0 %v739_v58 }
  0x17   : > { %621 = vadd.xlane.f32.xlu0 %v620_v6  ;;  %627 = vadd.xlane.f32.xlu1 %v626_v7 }
  0x18   : > { %3313 = vmatprep.subr.mxu1 %v738_v59  ;;  %3082 = vmatprep.subr.mxu0 %v738_v59 }
  0x19   : > { %3317 = vmatpush3.msra.mxu1 %v738_v59  ;;  %3083 = vmatpush3.msra.mxu0 %v738_v59 }
  0x1a   : > { %3096 = vmatprep.subr.mxu1 %v3690_v60  ;;  %3116 = vmatprep.subr.mxu0 %v3696_v61 }
  0x1b   : > { %606 = vadd.xlane.f32.xlu0 %v605_v10  ;;  %609 = vadd.xlane.f32.xlu1 %v608_v11 }
  0x1f   : > { %612 = vadd.xlane.f32.xlu0 %v611_v14  ;;  %615 = vadd.xlane.f32.xlu1 %v614_v15 }
  0x9c   : > { %v619_v16 = vpop.xlane.xlu0 %618  ;;  %v625_v17 = vpop.xlane.xlu1 %624 }
  0x9d   : > { %v634_v18 = vmul.f32 0.03125, %v619_v16  ;;  %v636_v19 = vmul.f32 0.03125, %v625_v17 }
  0x9f   : > { %v3628_v20 = vsub.f32 %v3588_v0, %v634_v18  ;;  %v3631_v21 = vsub.f32 %v3591_v1, %v636_v19 }
  0xa0   : > { %v622_v22 = vpop.xlane.xlu0 %621  ;;  %v628_v23 = vpop.xlane.xlu1 %627 }
  0xa1   : > { %v635_v24 = vmul.f32 0.03125, %v622_v22  ;;  %v637_v25 = vmul.f32 0.03125, %v628_v23  ;;  %v650_v26 = vmul.f32 %v3628_v20, %v3628_v20  ;;  %v652_v27 = vmul.f32 %v3631_v21, %v3631_v21 }
  0xa3   : > { %v3638_v28 = vsub.f32 %v3594_v2, %v635_v24  ;;  %v3641_v29 = vsub.f32 %v3601_v5, %v637_v25  ;;  %v666_v30 = vsel %vm604_vm0, %v650_v26, 0.0  ;;  %v672_v33 = vsel %vm604_vm0, %v652_v27, 0.0 }
  0xa4   : > { %667 = vadd.xlane.f32.xlu0 %v666_v30  ;;  %v607_v31 = vpop.xlane.xlu0 %606  ;;  %v610_v32 = vpop.xlane.xlu1 %609 }
  0xa5   : > { %v630_v34 = vmul.f32 0.03125, %v607_v31  ;;  %v651_v35 = vmul.f32 %v3638_v28, %v3638_v28  ;;  %v631_v36 = vmul.f32 0.03125, %v610_v32  ;;  %v653_v37 = vmul.f32 %v3641_v29, %v3641_v29 }
  0xa7   : > { %v3650_v38 = vsub.f32 %v3608_v8, %v630_v34  ;;  %v669_v39 = vsel %vm604_vm0, %v651_v35, 0.0  ;;  %v3654_v40 = vsub.f32 %v3611_v9, %v631_v36  ;;  %v675_v42 = vsel %vm604_vm0, %v653_v37, 0.0  ;;  %v2837_v34 = vld [vmem:[%s4255_s8] ss:$0 sm:$0xff] }
  0xa8   : > { %670 = vadd.xlane.f32.xlu1 %v669_v39  ;;  %673 = vadd.xlane.f32.xlu0 %v672_v33  ;;  %v613_v41 = vpop.xlane.xlu0 %612  ;;  %v616_v43 = vpop.xlane.xlu1 %615  ;;  %v2838_v37 = vld [vmem:[%s4256_s9] ss:$0 sm:$0xff] }
  0xa9   : > { %v632_v44 = vmul.f32 0.03125, %v613_v41  ;;  %v633_v45 = vmul.f32 0.03125, %v616_v43  ;;  %v646_v46 = vmul.f32 %v3650_v38, %v3650_v38  ;;  %v647_v47 = vmul.f32 %v3654_v40, %v3654_v40 }
  0xab   : > { %v3662_v48 = vsub.f32 %v3618_v12, %v632_v44  ;;  %v3665_v49 = vsub.f32 %v3621_v13, %v633_v45  ;;  %v654_v50 = vsel %vm604_vm0, %v646_v46, 0.0  ;;  %v657_v51 = vsel %vm604_vm0, %v647_v47, 0.0 }
  0xac   : > { %676 = vadd.xlane.f32.xlu1 %v675_v42  ;;  %655 = vadd.xlane.f32.xlu0 %v654_v50 }
  0xad   : > { %v648_v52 = vmul.f32 %v3662_v48, %v3662_v48  ;;  %v649_v53 = vmul.f32 %v3665_v49, %v3665_v49 }
  0xaf   : > { %v660_v54 = vsel %vm604_vm0, %v648_v52, 0.0  ;;  %v663_v55 = vsel %vm604_vm0, %v649_v53, 0.0 }
  0xb0   : > { %658 = vadd.xlane.f32.xlu1 %v657_v51  ;;  %661 = vadd.xlane.f32.xlu0 %v660_v54  ;;  %v873_v54 = vld [vmem:[%s4250_s3 + $0x10] sm:$0xff] }
  0xb4   : > { %664 = vadd.xlane.f32.xlu1 %v663_v55 }
 0x12d   : > { %v668_v62 = vpop.xlane.xlu0 %667 }
 0x12e   : > { %v682_v63 = vmul.f32 0.03125, %v668_v62  ;;  %v871_v62 = vld [vmem:[%s4250_s3] sm:$0xff] }
 0x130   : > { %v690_v3 = vadd.f32 1e-05, %v682_v63 }
 0x131   : > { %v671_v4 = vpop.xlane.xlu1 %670  ;;  %v674_v6 = vpop.xlane.xlu0 %673 }
 0x132   : > { %3328 = vrsqrt.f32 %v690_v3  ;;  %v683_v7 = vmul.f32 0.03125, %v671_v4  ;;  %v684_v10 = vmul.f32 0.03125, %v674_v6 }
 0x134   : > { %v691_v11 = vadd.f32 1e-05, %v683_v7  ;;  %v692_v14 = vadd.f32 1e-05, %v684_v10 }
 0x135   : > { %v677_v15 = vpop.xlane.xlu1 %676  ;;  %v656_v16 = vpop.xlane.xlu0 %655 }
 0x136   : > { %3330 = vrsqrt.f32 %v691_v11  ;;  %v685_v17 = vmul.f32 0.03125, %v677_v15  ;;  %v678_v18 = vmul.f32 0.03125, %v656_v16 }
 0x137   : > { %3332 = vrsqrt.f32 %v692_v14  ;;  %v980_v14 = vld [vmem:[%s4251_s4] sm:$0xff] }
 0x138   : > { %v693_v19 = vadd.f32 1e-05, %v685_v17  ;;  %v686_v22 = vadd.f32 1e-05, %v678_v18 }
 0x139   : > { %v659_v23 = vpop.xlane.xlu1 %658  ;;  %v662_v24 = vpop.xlane.xlu0 %661 }
 0x13a   : > { %3334 = vrsqrt.f32 %v693_v19  ;;  %v679_v25 = vmul.f32 0.03125, %v659_v23  ;;  %v680_v26 = vmul.f32 0.03125, %v662_v24 }
 0x13b   : > { %3336 = vrsqrt.f32 %v686_v22 }
 0x13c   : > { %v687_v27 = vadd.f32 1e-05, %v679_v25  ;;  %v688_v30 = vadd.f32 1e-05, %v680_v26 }
 0x13d   : > { %v665_v31 = vpop.xlane.xlu1 %664 }
 0x13e   : > { %3338 = vrsqrt.f32 %v687_v27  ;;  %v681_v32 = vmul.f32 0.03125, %v665_v31 }
 0x13f   : > { %v3329_v33 = vpop.eup %3328  ;;  %3340 = vrsqrt.f32 %v688_v30 }
 0x140   : > { %v689_v35 = vadd.f32 1e-05, %v681_v32  ;;  %v706_v36 = vmul.f32 %v3329_v33, %v3628_v20 }
 0x142   : > { %3342 = vrsqrt.f32 %v689_v35  ;;  %v720_v39 = vmul.f32 %v2837_v34, %v706_v36 }
 0x143   : > { %v3331_v41 = vpop.eup %3330 }
 0x144   : > { %v3333_v42 = vpop.eup %3332  ;;  %v3706_v43 = vadd.f32 %v2838_v37, %v720_v39  ;;  %v707_v44 = vmul.f32 %v3331_v41, %v3638_v28 }
 0x145   : > { %v708_v45 = vmul.f32 %v3333_v42, %v3631_v21 }
 0x146   : > { %3090 = vmatprep.mubr.msk.f32.mxu1 %vm604_vm0, %v3706_v43  ;;  %v721_v46 = vmul.f32 %v2837_v34, %v707_v44 }
 0x147   : > { %v3335_v47 = vpop.eup %3334  ;;  %v722_v20 = vmul.f32 %v2837_v34, %v708_v45 }
 0x148   : > { %v3337_v50 = vpop.eup %3336  ;;  %v735_v51 = vadd.f32 %v2838_v37, %v721_v46  ;;  %v709_v52 = vmul.f32 %v3335_v47, %v3641_v29 }
 0x149   : > { %v736_v53 = vadd.f32 %v2838_v37, %v722_v20  ;;  %v702_v55 = vmul.f32 %v3337_v50, %v3650_v38 }
 0x14a   : > { %3091 = vmatmul.mubr.msk.f32.vlgmr.msra.gmra.mxu1 %vm604_vm0, %v735_v51  ;;  %v723_v21 = vmul.f32 %v2837_v34, %v709_v52 }
 0x14b   : > { %v3339_v28 = vpop.eup %3338  ;;  %3097 = vmatpush3.msra.mxu1 %v3690_v60  ;;  %3093 = vmatprep.mubr.msk.f32.mxu1 %vm604_vm0, %v736_v53  ;;  %v716_v29 = vmul.f32 %v2837_v34, %v702_v55 }
 0x14c   : > { %v3341_v57 = vpop.eup %3340  ;;  %3098 = vmatprep.subr.mxu1 %v873_v54  ;;  %v737_v58 = vadd.f32 %v2838_v37, %v723_v21  ;;  %v703_v59 = vmul.f32 %v3339_v28, %v3654_v40 }
 0x14d   : > { %3099 = vmatpush3.msra.mxu1 %v873_v54  ;;  %v730_v38 = vadd.f32 %v2838_v37, %v716_v29  ;;  %v704_v60 = vmul.f32 %v3341_v57, %v3662_v48  ;;  %v982_v48 = vld [vmem:[%s4251_s4 + $0x10] sm:$0xff] }
 0x14e   : > { %3100 = vmatprep.subr.mxu1 %v872_v56  ;;  %3094 = vmatmul.mubr.msk.f32.gmra.mxu1 %vm604_vm0, %v737_v58  ;;  %v717_v63 = vmul.f32 %v2837_v34, %v703_v59 }
 0x14f   : > { %v3343_v3 = vpop.eup %3342  ;;  %3084 = vmatprep.mubr.msk.f32.mxu0 %vm604_vm0, %v730_v38  ;;  %3101 = vmatpush3.msra.mxu1 %v872_v56  ;;  %v718_v4 = vmul.f32 %v2837_v34, %v704_v60 }
 0x150   : > { %3102 = vmatprep.subr.mxu1 %v871_v62  ;;  %3104 = vmatprep.mubr.msk.f32.mxu1 %vm604_vm0, %v730_v38  ;;  %v731_v40 = vadd.f32 %v2838_v37, %v717_v63  ;;  %v705_v6 = vmul.f32 %v3343_v3, %v3665_v49  ;;  %v981_v49 = vld [vmem:[%s4251_s4 + $0x8] sm:$0xff] }
 0x151   : > { %3103 = vmatpush3.msra.mxu1 %v871_v62  ;;  %v732_v7 = vadd.f32 %v2838_v37, %v718_v4 }
 0x152   : > { %3085 = vmatmul.mubr.msk.f32.vlgmr.msra.gmra.mxu0 %vm604_vm0, %v731_v40  ;;  %3105 = vmatmul.mubr.msk.f32.vlgmr.msra.gmra.mxu1 %vm604_vm0, %v731_v40  ;;  %v719_v10 = vmul.f32 %v2837_v34, %v705_v6 }
 0x153   : > { %3087 = vmatprep.mubr.msk.f32.mxu0 %vm604_vm0, %v732_v7  ;;  %3107 = vmatprep.mubr.msk.f32.mxu1 %vm604_vm0, %v732_v7 }
 0x154   : > { %3117 = vmatpush3.msra.mxu0 %v3696_v61  ;;  %v733_v11 = vadd.f32 %v2838_v37, %v719_v10 }
 0x155   : > { %3118 = vmatprep.subr.mxu0 %v982_v48 }
 0x156   : > { %3119 = vmatpush3.msra.mxu0 %v982_v48  ;;  %3108 = vmatmul.mubr.msk.f32.gmra.mxu1 %vm604_vm0, %v733_v11 }
 0x157   : > { %3088 = vmatmul.mubr.msk.f32.gmra.mxu0 %vm604_vm0, %v733_v11  ;;  %3120 = vmatprep.subr.mxu0 %v981_v49 }
 0x158   : > { %3110 = vmatprep.mubr.msk.f32.mxu1 %vm604_vm0, %v3706_v43  ;;  %3121 = vmatpush3.msra.mxu0 %v981_v49 }
 0x159   : > { %3124 = vmatprep.mubr.msk.f32.mxu0 %vm604_vm0, %v730_v38  ;;  %3122 = vmatprep.subr.mxu0 %v980_v14 }
 0x15a   : > { %3123 = vmatpush3.msra.mxu0 %v980_v14  ;;  %3111 = vmatmul.mubr.msk.f32.gmra.mxu1 %vm604_vm0, %v735_v51 }
 0x15b   : > { %3125 = vmatmul.mubr.msk.f32.vlgmr.msra.gmra.mxu0 %vm604_vm0, %v731_v40  ;;  %3113 = vmatprep.mubr.msk.f32.mxu1 %vm604_vm0, %v736_v53 }
 0x15c   : > { %3127 = vmatprep.mubr.msk.f32.mxu0 %vm604_vm0, %v732_v7 }
 0x15e   : > { %3114 = vmatmul.mubr.msk.f32.gmra.mxu1 %vm604_vm0, %v737_v58 }
 0x15f   : > { %3128 = vmatmul.mubr.msk.f32.gmra.mxu0 %vm604_vm0, %v733_v11 }
 0x160   : > { %3130 = vmatprep.mubr.msk.f32.mxu0 %vm604_vm0, %v3706_v43 }
 0x163   : > { %3131 = vmatmul.mubr.msk.f32.gmra.mxu0 %vm604_vm0, %v735_v51 }
 0x164   : > { %3133 = vmatprep.mubr.msk.f32.mxu0 %vm604_vm0, %v736_v53 }
 0x167   : > { %3134 = vmatmul.mubr.msk.f32.gmra.mxu0 %vm604_vm0, %v737_v58 }
 0x20a   : > { %v3092_v61 = vpop.f32.mrf.mxu1 }
 0x20c   : > { %v852_v15 = vpop.f32.mrf.mxu1 }
 0x20e   : > { %v3095_v16 = vpop.f32.mrf.mxu1 }
 0x210   : > { %v862_v17 = vpop.f32.mrf.mxu1 }
 0x212   : > { %v3086_v18 = vpop.f32.mrf.mxu0  ;;  %v3106_v19 = vpop.f32.mrf.mxu1 }
 0x214   : > { %v832_v22 = vpop.f32.mrf.mxu0  ;;  %v941_v23 = vpop.f32.mrf.mxu1 }
 0x215   : > { %3152 = vmatprep.mubr.msk.f32.mxu1 %vm604_vm0, %v832_v22 }
 0x216   : > { %v3109_v24 = vpop.f32.mrf.mxu1 }
 0x217   : > { %v3089_v25 = vpop.f32.mrf.mxu0 }
 0x218   : > { %v951_v26 = vpop.f32.mrf.mxu1 }
 0x219   : > { %v842_v27 = vpop.f32.mrf.mxu0 }
 0x21a   : > { %v3112_v30 = vpop.f32.mrf.mxu1 }
 0x21b   : > { %v3126_v31 = vpop.f32.mrf.mxu0 }
 0x21c   : > { %v961_v32 = vpop.f32.mrf.mxu1 }
 0x21d   : > { %v1050_v33 = vpop.f32.mrf.mxu0 }
 0x21e   : > { %v3115_v34 = vpop.f32.mrf.mxu1 }
 0x21f   : > { %v3129_v35 = vpop.f32.mrf.mxu0  ;;  %3136 = vmatprep.subr.msk.mxu1 %vm604_vm0, %v3115_v34 }
 0x220   : > { %v971_v36 = vpop.f32.mrf.mxu1  ;;  %3137 = vmatpush3.xpose.msk.msra.mxu1 %vm604_vm0, %v3115_v34 }
 0x221   : > { %v1060_v37 = vpop.f32.mrf.mxu0  ;;  %3138 = vmatprep.subr.msk.mxu1 %vm604_vm0, %v971_v36 }
 0x223   : > { %v3132_v39 = vpop.f32.mrf.mxu0 }
 0x224   : > { %3139 = vmatpush3.xpose.msk.msra.mxu1 %vm604_vm0, %v971_v36 }
 0x225   : > { %v1070_v41 = vpop.f32.mrf.mxu0  ;;  %3140 = vmatprep.subr.msk.mxu1 %vm604_vm0, %v3112_v30 }
 0x227   : > { %v3135_v42 = vpop.f32.mrf.mxu0 }
 0x228   : > { %3164 = vmatprep.subr.mxu0 %v3135_v42  ;;  %3141 = vmatpush3.xpose.msk.msra.mxu1 %vm604_vm0, %v3112_v30 }
 0x229   : > { %v1080_v43 = vpop.f32.mrf.mxu0  ;;  %3165 = vmatpush3.msra.mxu0 %v3135_v42  ;;  %3142 = vmatprep.subr.msk.mxu1 %vm604_vm0, %v961_v32 }
 0x22a   : > { %3166 = vmatprep.subr.mxu0 %v1080_v43 }
 0x22b   : > { %3167 = vmatpush3.msra.mxu0 %v1080_v43 }
 0x22c   : > { %3168 = vmatprep.subr.mxu0 %v3132_v39  ;;  %3143 = vmatpush3.xpose.msk.msra.mxu1 %vm604_vm0, %v961_v32 }
 0x22d   : > { %3169 = vmatpush3.msra.mxu0 %v3132_v39  ;;  %3144 = vmatprep.subr.msk.mxu1 %vm604_vm0, %v3109_v24 }
 0x22e   : > { %3170 = vmatprep.subr.mxu0 %v1070_v41 }
 0x22f   : > { %3171 = vmatpush3.msra.mxu0 %v1070_v41 }
 0x230   : > { %3172 = vmatprep.subr.mxu0 %v3129_v35  ;;  %3145 = vmatpush3.xpose.msk.msra.mxu1 %vm604_vm0, %v3109_v24 }
 0x231   : > { %3173 = vmatpush3.msra.mxu0 %v3129_v35  ;;  %3146 = vmatprep.subr.msk.mxu1 %vm604_vm0, %v951_v26 }
 0x232   : > { %3174 = vmatprep.subr.mxu0 %v1060_v37 }
 0x233   : > { %3175 = vmatpush3.msra.mxu0 %v1060_v37 }
 0x234   : > { %3176 = vmatprep.subr.mxu0 %v3126_v31  ;;  %3147 = vmatpush3.xpose.msk.msra.mxu1 %vm604_vm0, %v951_v26 }
 0x235   : > { %3177 = vmatpush3.msra.mxu0 %v3126_v31  ;;  %3148 = vmatprep.subr.msk.mxu1 %vm604_vm0, %v3106_v19 }
 0x236   : > { %3178 = vmatprep.subr.mxu0 %v1050_v33 }
 0x237   : > { %3179 = vmatpush3.msra.mxu0 %v1050_v33 }
 0x238   : > { %3149 = vmatpush3.xpose.msk.msra.mxu1 %vm604_vm0, %v3106_v19 }
 0x239   : > { %3150 = vmatprep.subr.msk.mxu1 %vm604_vm0, %v941_v23 }
 0x23c   : > { %3151 = vmatpush3.xpose.msk.msra.mxu1 %vm604_vm0, %v941_v23 }
 0x23f   : > { %3153 = vmatmul.mubr.msk.f32.vlgmr.msra.gmra.mxu1 %vm604_vm0, %v3086_v18 }
 0x240   : > { %3155 = vmatprep.mubr.msk.f32.mxu1 %vm604_vm0, %v842_v27 }
 0x243   : > { %3156 = vmatmul.mubr.msk.f32.gmra.mxu1 %vm604_vm0, %v3089_v25 }
 0x244   : > { %3158 = vmatprep.mubr.msk.f32.mxu1 %vm604_vm0, %v852_v15 }
 0x247   : > { %3159 = vmatmul.mubr.msk.f32.gmra.mxu1 %vm604_vm0, %v3092_v61 }
 0x248   : > { %3161 = vmatprep.mubr.msk.f32.mxu1 %vm604_vm0, %v862_v17 }
 0x24b   : > { %3162 = vmatmul.mubr.msk.f32.gmra.mxu1 %vm604_vm0, %v3095_v16 }
 0x2ff   : > { %v3154_v44 = vpop.f32.mrf.mxu1 }
 0x300   : > { %v1246_v45 = vsel %vm1242_vm1, %v3154_v44, -inf }
 0x301   : > { %1247 = vmax.xlane.f32.xlu1 %v1246_v45  ;;  %v1203_v46 = vpop.f32.mrf.mxu1 }
 0x302   : > { %v1243_v47 = vsel %vm1242_vm1, %v1203_v46, -inf }
 0x303   : > { %1244 = vmax.xlane.f32.xlu0 %v1243_v47  ;;  %v3157_v20 = vpop.f32.mrf.mxu1 }
 0x304   : > { %v1252_v50 = vsel %vm1242_vm1, %v3157_v20, -inf }
 0x305   : > { %1253 = vmax.xlane.f32.xlu1 %v1252_v50  ;;  %v1213_v51 = vpop.f32.mrf.mxu1 }
 0x306   : > { %v1249_v52 = vsel %vm1242_vm1, %v1213_v51, -inf }
 0x307   : > { %1250 = vmax.xlane.f32.xlu0 %v1249_v52  ;;  %v3160_v53 = vpop.f32.mrf.mxu1 }
 0x308   : > { %v1258_v54 = vsel %vm1242_vm1, %v3160_v53, -inf }
 0x309   : > { %1259 = vmax.xlane.f32.xlu1 %v1258_v54  ;;  %v1223_v55 = vpop.f32.mrf.mxu1 }
 0x30a   : > { %v1255_v21 = vsel %vm1242_vm1, %v1223_v55, -inf }
 0x30b   : > { %1256 = vmax.xlane.f32.xlu0 %v1255_v21  ;;  %v3163_v28 = vpop.f32.mrf.mxu1 }
 0x30c   : > { %v1264_v56 = vsel %vm1242_vm1, %v3163_v28, -inf }
 0x30d   : > { %1265 = vmax.xlane.f32.xlu1 %v1264_v56  ;;  %v1233_v29 = vpop.f32.mrf.mxu1 }
 0x30e   : > { %v1261_v57 = vsel %vm1242_vm1, %v1233_v29, -inf }
 0x30f   : > { %1262 = vmax.xlane.f32.xlu0 %v1261_v57 }
 0x38a   : > { %v1248_v58 = vpop.xlane.xlu1 %1247 }
 0x38b   : > { %v1268_v59 = vsub.f32 %v3154_v44, %v1248_v58 }
 0x38c   : > { %v1245_v38 = vpop.xlane.xlu0 %1244 }
 0x38d   : > { %v1277_v62 = vmul.f32 1.442695, %v1268_v59  ;;  %v1267_v60 = vsub.f32 %v1203_v46, %v1245_v38 }
 0x38e   : > { %v1254_v63 = vpop.xlane.xlu1 %1253 }
 0x38f   : > { %3344 = vpow2.f32 %v1277_v62  ;;  %v1275_v3 = vmul.f32 1.442695, %v1267_v60  ;;  %v1270_v4 = vsub.f32 %v3157_v20, %v1254_v63 }
 0x390   : > { %v1251_v40 = vpop.xlane.xlu0 %1250 }
 0x391   : > { %3346 = vpow2.f32 %v1275_v3  ;;  %v1281_v6 = vmul.f32 1.442695, %v1270_v4  ;;  %v1269_v7 = vsub.f32 %v1213_v51, %v1251_v40 }
 0x392   : > { %v1260_v48 = vpop.xlane.xlu1 %1259 }
 0x393   : > { %3348 = vpow2.f32 %v1281_v6  ;;  %v1279_v10 = vmul.f32 1.442695, %v1269_v7  ;;  %v1272_v11 = vsub.f32 %v3160_v53, %v1260_v48 }
 0x394   : > { %v1257_v49 = vpop.xlane.xlu0 %1256 }
 0x395   : > { %3350 = vpow2.f32 %v1279_v10  ;;  %v1285_v14 = vmul.f32 1.442695, %v1272_v11  ;;  %v1271_v61 = vsub.f32 %v1223_v55, %v1257_v49 }
 0x396   : > { %v1266_v15 = vpop.xlane.xlu1 %1265 }
 0x397   : > { %3352 = vpow2.f32 %v1285_v14  ;;  %v1283_v16 = vmul.f32 1.442695, %v1271_v61  ;;  %v1274_v17 = vsub.f32 %v3163_v28, %v1266_v15 }
 0x398   : > { %v1263_v18 = vpop.xlane.xlu0 %1262 }
 0x399   : > { %3354 = vpow2.f32 %v1283_v16  ;;  %v1289_v19 = vmul.f32 1.442695, %v1274_v17  ;;  %v1273_v22 = vsub.f32 %v1233_v29, %v1263_v18 }
 0x39b   : > { %3356 = vpow2.f32 %v1289_v19  ;;  %v1287_v23 = vmul.f32 1.442695, %v1273_v22 }
 0x39c   : > { %v3345_v24 = vpop.eup %3344 }
 0x39d   : > { %3358 = vpow2.f32 %v1287_v23  ;;  %v1294_v25 = vsel %vm1242_vm1, %v3345_v24, 0.0 }
 0x39e   : > { %v3347_v26 = vpop.eup %3346  ;;  %1295 = vadd.xlane.f32.xlu1 %v1294_v25 }
 0x39f   : > { %v1291_v27 = vsel %vm1242_vm1, %v3347_v26, 0.0 }
 0x3a0   : > { %v3349_v30 = vpop.eup %3348  ;;  %1292 = vadd.xlane.f32.xlu0 %v1291_v27 }
 0x3a1   : > { %v1300_v31 = vsel %vm1242_vm1, %v3349_v30, 0.0 }
 0x3a2   : > { %v3351_v32 = vpop.eup %3350  ;;  %1301 = vadd.xlane.f32.xlu1 %v1300_v31 }
 0x3a3   : > { %v1297_v33 = vsel %vm1242_vm1, %v3351_v32, 0.0 }
 0x3a4   : > { %v3353_v34 = vpop.eup %3352  ;;  %1298 = vadd.xlane.f32.xlu0 %v1297_v33 }
 0x3a5   : > { %v1306_v35 = vsel %vm1242_vm1, %v3353_v34, 0.0 }
 0x3a6   : > { %v3355_v36 = vpop.eup %3354  ;;  %1307 = vadd.xlane.f32.xlu1 %v1306_v35 }
 0x3a7   : > { %v1303_v37 = vsel %vm1242_vm1, %v3355_v36, 0.0 }
 0x3a8   : > { %v3357_v39 = vpop.eup %3356  ;;  %1304 = vadd.xlane.f32.xlu0 %v1303_v37 }
 0x3a9   : > { %v1312_v41 = vsel %vm1242_vm1, %v3357_v39, 0.0 }
 0x3aa   : > { %v3359_v42 = vpop.eup %3358  ;;  %1313 = vadd.xlane.f32.xlu1 %v1312_v41 }
 0x3ab   : > { %v1309_v43 = vsel %vm1242_vm1, %v3359_v42, 0.0 }
 0x3ac   : > { %1310 = vadd.xlane.f32.xlu0 %v1309_v43 }
 0x427   : > { %v1296_v44 = vpop.xlane.xlu1 %1295 }
 0x428   : > { %3360 = vrcp.f32 %v1296_v44 }
 0x429   : > { %v1293_v45 = vpop.xlane.xlu0 %1292 }
 0x42a   : > { %3362 = vrcp.f32 %v1293_v45 }
 0x42b   : > { %v1302_v46 = vpop.xlane.xlu1 %1301 }
 0x42c   : > { %3364 = vrcp.f32 %v1302_v46 }
 0x42d   : > { %v1299_v47 = vpop.xlane.xlu0 %1298 }
 0x42e   : > { %3366 = vrcp.f32 %v1299_v47 }
 0x42f   : > { %v1308_v20 = vpop.xlane.xlu1 %1307 }
 0x430   : > { %3368 = vrcp.f32 %v1308_v20 }
 0x431   : > { %v1305_v50 = vpop.xlane.xlu0 %1304 }
 0x432   : > { %3370 = vrcp.f32 %v1305_v50 }
 0x433   : > { %v1314_v51 = vpop.xlane.xlu1 %1313 }
 0x434   : > { %3372 = vrcp.f32 %v1314_v51 }
 0x435   : > { %v1311_v52 = vpop.xlane.xlu0 %1310  ;;  %v3361_v53 = vpop.eup %3360 }
 0x436   : > { %3374 = vrcp.f32 %v1311_v52  ;;  %v1318_v21 = vmul.f32 %v3361_v53, %v3345_v24 }
 0x437   : > { %v3363_v54 = vpop.eup %3362 }
 0x438   : > { %v1316_v55 = vmul.f32 %v3363_v54, %v3347_v26 }
 0x439   : > { %v3365_v28 = vpop.eup %3364 }
 0x43a   : > { %3180 = vmatprep.mubr.msk.f32.mxu0 %vm1242_vm1, %v1316_v55  ;;  %v1322_v57 = vmul.f32 %v3365_v28, %v3349_v30 }
 0x43b   : > { %v3367_v56 = vpop.eup %3366  ;;  %3181 = vmatmul.mubr.msk.f32.vlgmr.msra.gmra.mxu0 %vm1242_vm1, %v1318_v21 }
 0x43c   : > { %v1320_v29 = vmul.f32 %v3367_v56, %v3351_v32 }
 0x43d   : > { %v3369_v58 = vpop.eup %3368 }
 0x43e   : > { %3183 = vmatprep.mubr.msk.f32.mxu0 %vm1242_vm1, %v1320_v29  ;;  %v1326_v62 = vmul.f32 %v3369_v58, %v3353_v34 }
 0x43f   : > { %v3371_v59 = vpop.eup %3370  ;;  %3184 = vmatmul.mubr.msk.f32.gmra.mxu0 %vm1242_vm1, %v1322_v57 }
 0x440   : > { %v1324_v38 = vmul.f32 %v3371_v59, %v3355_v36 }
 0x441   : > { %v3373_v60 = vpop.eup %3372 }
 0x442   : > { %3186 = vmatprep.mubr.msk.f32.mxu0 %vm1242_vm1, %v1324_v38  ;;  %v1330_v4 = vmul.f32 %v3373_v60, %v3357_v39 }
 0x443   : > { %v3375_v63 = vpop.eup %3374  ;;  %3187 = vmatmul.mubr.msk.f32.gmra.mxu0 %vm1242_vm1, %v1326_v62 }
 0x444   : > { %v1328_v3 = vmul.f32 %v3375_v63, %v3359_v42 }
 0x446   : > { %3189 = vmatprep.mubr.msk.f32.mxu0 %vm1242_vm1, %v1328_v3 }
 0x447   : > { %3190 = vmatmul.mubr.msk.f32.gmra.mxu0 %vm1242_vm1, %v1330_v4 }
 0x4fb   : > { %v3182_v40 = vpop.f32.mrf.mxu0 }
 0x4fc   : > { %v3811_v6 = vadd.f32 %v3182_v40, %v3611_v9  ;;  %v1605_v40 = vld [vmem:[%s4252_s5 + $0x18] sm:$0xff] }
 0x4fd   : > { %v1421_v7 = vpop.f32.mrf.mxu0  ;;  %3192 = vmatprep.subr.mxu0 %v1605_v40 }
 0x4fe   : > { %v3814_v48 = vadd.f32 %v1421_v7, %v3608_v8  ;;  %v1473_v10 = vsel %vm604_vm0, %v3811_v6, 0.0  ;;  %v1736_v7 = vld [vmem:[%s4253_s6 + $0x8] sm:$0xff]  ;;  %3193 = vmatpush3.msra.mxu0 %v1605_v40 }
 0x4ff   : > { %1474 = vadd.xlane.f32.xlu1 %v1473_v10  ;;  %v3185_v11 = vpop.f32.mrf.mxu0  ;;  %v1604_v10 = vld [vmem:[%s4252_s5 + $0x10] sm:$0xff] }
 0x500   : > { %v3819_v49 = vadd.f32 %v3185_v11, %v3621_v13  ;;  %v1470_v14 = vsel %vm604_vm0, %v3814_v48, 0.0  ;;  %v3472_v11 = vmov 0.0   ;;  %3194 = vmatprep.subr.mxu0 %v1604_v10 }
 0x501   : > { %1471 = vadd.xlane.f32.xlu0 %v1470_v14  ;;  %v1431_v61 = vpop.f32.mrf.mxu0  ;;  %3212 = vmatprep.subr.mxu1 %v3472_v11  ;;  %v1735_v14 = vld [vmem:[%s4253_s6] sm:$0xff] }
 0x502   : > { %v3824_v9 = vadd.f32 %v1431_v61, %v3618_v12  ;;  %v1479_v8 = vsel %vm604_vm0, %v3819_v49, 0.0  ;;  %3213 = vmatpush3.msra.mxu1 %v1736_v7  ;;  %v1603_v61 = vld [vmem:[%s4252_s5 + $0x8] sm:$0xff]  ;;  %3195 = vmatpush3.msra.mxu0 %v1604_v10 }
 0x503   : > { %1480 = vadd.xlane.f32.xlu1 %v1479_v8  ;;  %v3188_v15 = vpop.f32.mrf.mxu0  ;;  %3214 = vmatprep.subr.mxu1 %v3472_v11  ;;  %v601_v8 = vld [vmem:[%s587_s19] sm:$0xff] }
 0x504   : > { %v3829_v16 = vadd.f32 %v3188_v15, %v3594_v2  ;;  %v1476_v13 = vsel %vm604_vm0, %v3824_v9, 0.0  ;;  %3215 = vmatpush3.msra.mxu1 %v1735_v14  ;;  %v1602_v15 = vld [vmem:[%s4252_s5] sm:$0xff]  ;;  %3196 = vmatprep.subr.mxu0 %v1603_v61 }
 0x505   : > { %1477 = vadd.xlane.f32.xlu0 %v1476_v13  ;;  %v1441_v17 = vpop.f32.mrf.mxu0  ;;  %3216 = vmatprep.mubr.msk.f32.mxu1 %vm3473_vm3, %v3472_v11  ;;  %v1812_v13 = vld [vmem:[%s4254_s7 + $0x8] sm:$0xff] }
 0x506   : > { %v3834_v18 = vadd.f32 %v1441_v17, %v3588_v0  ;;  %v1485_v12 = vsel %vm604_vm0, %v3829_v16, 0.0  ;;  %3197 = vmatpush3.msra.mxu0 %v1603_v61  ;;  %3217 = vmatmul.mubr.msk.f32.vlgmr.msra.gmra.mxu1 %vm1737_vm2, %v601_v8  ;;  %v1811_v17 = vld [vmem:[%s4254_s7] sm:$0xff] }
 0x507   : > { %1486 = vadd.xlane.f32.xlu1 %v1485_v12  ;;  %v3191_v19 = vpop.f32.mrf.mxu0  ;;  %3198 = vmatprep.subr.mxu0 %v1602_v15 }
 0x508   : > { %v3839_v22 = vadd.f32 %v3191_v19, %v3601_v5  ;;  %v1482_v2 = vsel %vm604_vm0, %v3834_v18, 0.0  ;;  %3219 = vmatprep.subr.mxu1 %v3472_v11  ;;  %3199 = vmatpush3.msra.mxu0 %v1602_v15 }
 0x509   : > { %1483 = vadd.xlane.f32.xlu0 %v1482_v2  ;;  %v1451_v23 = vpop.f32.mrf.mxu0  ;;  %3223 = vmatprep.mubr.msk.f32.mxu1 %vm3473_vm3, %v3472_v11 }
 0x50a   : > { %v3844_v24 = vadd.f32 %v1451_v23, %v3591_v1  ;;  %v1491_v0 = vsel %vm604_vm0, %v3839_v22, 0.0  ;;  %3220 = vmatpush3.msra.mxu1 %v1812_v13 }
 0x50b   : > { %1492 = vadd.xlane.f32.xlu1 %v1491_v0  ;;  %3221 = vmatprep.subr.mxu1 %v3472_v11 }
 0x50c   : > { %v1488_v25 = vsel %vm604_vm0, %v3844_v24, 0.0  ;;  %3222 = vmatpush3.msra.mxu1 %v1811_v17 }
 0x50d   : > { %1489 = vadd.xlane.f32.xlu0 %v1488_v25  ;;  %3224 = vmatmul.mubr.msk.f32.vlgmr.msra.gmra.mxu1 %vm1737_vm2, %v601_v8 }
 0x588   : > { %v1475_v26 = vpop.xlane.xlu1 %1474 }
 0x589   : > { %v1495_v27 = vmul.f32 0.03125, %v1475_v26 }
 0x58a   : > { %v1472_v5 = vpop.xlane.xlu0 %1471 }
 0x58b   : > { %v3851_v30 = vsub.f32 %v3811_v6, %v1495_v27  ;;  %v1494_v31 = vmul.f32 0.03125, %v1472_v5 }
 0x58c   : > { %v1481_v32 = vpop.xlane.xlu1 %1480 }
 0x58d   : > { %v3854_v33 = vsub.f32 %v3814_v48, %v1494_v31  ;;  %v1497_v1 = vmul.f32 0.03125, %v1481_v32  ;;  %v1511_v34 = vmul.f32 %v3851_v30, %v3851_v30 }
 0x58e   : > { %v1478_v35 = vpop.xlane.xlu0 %1477 }
 0x58f   : > { %v3859_v36 = vsub.f32 %v3819_v49, %v1497_v1  ;;  %v1496_v37 = vmul.f32 0.03125, %v1478_v35  ;;  %v1521_v39 = vsel %vm604_vm0, %v1511_v34, 0.0  ;;  %v1510_v41 = vmul.f32 %v3854_v33, %v3854_v33 }
 0x590   : > { %v1487_v42 = vpop.xlane.xlu1 %1486  ;;  %1522 = vadd.xlane.f32.xlu1 %v1521_v39 }
 0x591   : > { %v3865_v43 = vsub.f32 %v3824_v9, %v1496_v37  ;;  %v1499_v44 = vmul.f32 0.03125, %v1487_v42  ;;  %v1518_v45 = vsel %vm604_vm0, %v1510_v41, 0.0  ;;  %v1513_v46 = vmul.f32 %v3859_v36, %v3859_v36 }
 0x592   : > { %v1484_v47 = vpop.xlane.xlu0 %1483  ;;  %1519 = vadd.xlane.f32.xlu0 %v1518_v45 }
 0x593   : > { %v3871_v20 = vsub.f32 %v3829_v16, %v1499_v44  ;;  %v1498_v50 = vmul.f32 0.03125, %v1484_v47  ;;  %v1527_v51 = vsel %vm604_vm0, %v1513_v46, 0.0  ;;  %v1512_v52 = vmul.f32 %v3865_v43, %v3865_v43 }
 0x594   : > { %1528 = vadd.xlane.f32.xlu1 %v1527_v51  ;;  %v1493_v53 = vpop.xlane.xlu1 %1492 }
 0x595   : > { %v3877_v54 = vsub.f32 %v3834_v18, %v1498_v50  ;;  %v1501_v55 = vmul.f32 0.03125, %v1493_v53  ;;  %v1524_v21 = vsel %vm604_vm0, %v1512_v52, 0.0  ;;  %v1515_v28 = vmul.f32 %v3871_v20, %v3871_v20  ;;  %v2887_v53 = vld [vmem:[%s4257_s10] ss:$0 sm:$0xff] }
 0x596   : > { %1525 = vadd.xlane.f32.xlu0 %v1524_v21  ;;  %v1490_v56 = vpop.xlane.xlu0 %1489 }
 0x597   : > { %v3883_v29 = vsub.f32 %v3839_v22, %v1501_v55  ;;  %v1500_v57 = vmul.f32 0.03125, %v1490_v56  ;;  %v1533_v58 = vsel %vm604_vm0, %v1515_v28, 0.0  ;;  %v1514_v59 = vmul.f32 %v3877_v54, %v3877_v54 }
 0x598   : > { %1534 = vadd.xlane.f32.xlu1 %v1533_v58  ;;  %v2888_v58 = vld [vmem:[%s4258_s11] ss:$0 sm:$0xff] }
 0x599   : > { %v3889_v38 = vsub.f32 %v3844_v24, %v1500_v57  ;;  %v1530_v62 = vsel %vm604_vm0, %v1514_v59, 0.0  ;;  %v1517_v60 = vmul.f32 %v3883_v29, %v3883_v29 }
 0x59a   : > { %1531 = vadd.xlane.f32.xlu0 %v1530_v62 }
 0x59b   : > { %v1539_v63 = vsel %vm604_vm0, %v1517_v60, 0.0  ;;  %v1516_v3 = vmul.f32 %v3889_v38, %v3889_v38 }
 0x59c   : > { %1540 = vadd.xlane.f32.xlu1 %v1539_v63 }
 0x59d   : > { %v1536_v4 = vsel %vm604_vm0, %v1516_v3, 0.0 }
 0x59e   : > { %1537 = vadd.xlane.f32.xlu0 %v1536_v4 }
 0x619   : > { %v1523_v12 = vpop.xlane.xlu1 %1522 }
 0x61a   : > { %v1543_v19 = vmul.f32 0.03125, %v1523_v12 }
 0x61b   : > { %v1520_v2 = vpop.xlane.xlu0 %1519 }
 0x61c   : > { %v1551_v23 = vadd.f32 1e-05, %v1543_v19  ;;  %v1542_v0 = vmul.f32 0.03125, %v1520_v2 }
 0x61d   : > { %v1529_v25 = vpop.xlane.xlu1 %1528 }
 0x61e   : > { %3376 = vrsqrt.f32 %v1551_v23  ;;  %v1550_v26 = vadd.f32 1e-05, %v1542_v0  ;;  %v1545_v27 = vmul.f32 0.03125, %v1529_v25 }
 0x61f   : > { %v1526_v5 = vpop.xlane.xlu0 %1525 }
 0x620   : > { %3378 = vrsqrt.f32 %v1550_v26  ;;  %v1553_v31 = vadd.f32 1e-05, %v1545_v27  ;;  %v1544_v32 = vmul.f32 0.03125, %v1526_v5 }
 0x621   : > { %v1535_v1 = vpop.xlane.xlu1 %1534 }
 0x622   : > { %3380 = vrsqrt.f32 %v1553_v31  ;;  %v1552_v34 = vadd.f32 1e-05, %v1544_v32  ;;  %v1547_v35 = vmul.f32 0.03125, %v1535_v1 }
 0x623   : > { %v1532_v37 = vpop.xlane.xlu0 %1531 }
 0x624   : > { %3382 = vrsqrt.f32 %v1552_v34  ;;  %v1555_v39 = vadd.f32 1e-05, %v1547_v35  ;;  %v1546_v41 = vmul.f32 0.03125, %v1532_v37 }
 0x625   : > { %v1541_v42 = vpop.xlane.xlu1 %1540 }
 0x626   : > { %3384 = vrsqrt.f32 %v1555_v39  ;;  %v1554_v44 = vadd.f32 1e-05, %v1546_v41  ;;  %v1549_v45 = vmul.f32 0.03125, %v1541_v42 }
 0x627   : > { %v1538_v46 = vpop.xlane.xlu0 %1537 }
 0x628   : > { %3386 = vrsqrt.f32 %v1554_v44  ;;  %v1557_v47 = vadd.f32 1e-05, %v1549_v45  ;;  %v1548_v50 = vmul.f32 0.03125, %v1538_v46 }
 0x62a   : > { %3388 = vrsqrt.f32 %v1557_v47  ;;  %v1556_v51 = vadd.f32 1e-05, %v1548_v50 }
 0x62b   : > { %v3377_v52 = vpop.eup %3376 }
 0x62c   : > { %v1567_v55 = vmul.f32 %v3377_v52, %v3851_v30  ;;  %3390 = vrsqrt.f32 %v1556_v51 }
 0x62d   : > { %v3379_v21 = vpop.eup %3378 }
 0x62e   : > { %v1566_v28 = vmul.f32 %v3379_v21, %v3854_v33  ;;  %v1581_v57 = vmul.f32 %v2887_v53, %v1567_v55 }
 0x62f   : > { %v3381_v56 = vpop.eup %3380 }
 0x630   : > { %v1580_v59 = vmul.f32 %v2887_v53, %v1566_v28  ;;  %v1569_v62 = vmul.f32 %v3381_v56, %v3859_v36  ;;  %v1595_v40 = vadd.f32 %v2888_v58, %v1581_v57 }
 0x631   : > { %v3383_v60 = vpop.eup %3382 }
 0x632   : > { %v1594_v63 = vadd.f32 %v2888_v58, %v1580_v59  ;;  %v1568_v3 = vmul.f32 %v3383_v60, %v3865_v43  ;;  %v1583_v30 = vmul.f32 %v2887_v53, %v1569_v62 }
 0x633   : > { %v3385_v4 = vpop.eup %3384 }
 0x634   : > { %3200 = vmatprep.mubr.msk.f32.mxu0 %vm604_vm0, %v1594_v63  ;;  %v1582_v7 = vmul.f32 %v2887_v53, %v1568_v3  ;;  %v1571_v33 = vmul.f32 %v3385_v4, %v3871_v20  ;;  %v1597_v36 = vadd.f32 %v2888_v58, %v1583_v30 }
 0x635   : > { %v3387_v10 = vpop.eup %3386  ;;  %3201 = vmatmul.mubr.msk.f32.vlgmr.msra.gmra.mxu0 %vm604_vm0, %v1595_v40 }
 0x636   : > { %v1596_v11 = vadd.f32 %v2888_v58, %v1582_v7  ;;  %v1570_v14 = vmul.f32 %v3387_v10, %v3877_v54  ;;  %v1585_v8 = vmul.f32 %v2887_v53, %v1571_v33 }
 0x637   : > { %v3389_v61 = vpop.eup %3388 }
 0x638   : > { %3203 = vmatprep.mubr.msk.f32.mxu0 %vm604_vm0, %v1596_v11  ;;  %v1584_v43 = vmul.f32 %v2887_v53, %v1570_v14  ;;  %v1573_v15 = vmul.f32 %v3389_v61, %v3883_v29  ;;  %v1599_v12 = vadd.f32 %v2888_v58, %v1585_v8  ;;  %v1807_v29 = vpop.f32.mrf.mxu1 }
 0x639   : > { %v3391_v13 = vpop.eup %3390  ;;  %3204 = vmatmul.mubr.msk.f32.gmra.mxu0 %vm604_vm0, %v1597_v36  ;;  %3226 = vmatprep.subr.msk.mxu1 %vm604_vm0, %v1807_v29 }
 0x63a   : > { %v1598_v17 = vadd.f32 %v2888_v58, %v1584_v43  ;;  %v1572_v20 = vmul.f32 %v3391_v13, %v3889_v38  ;;  %v1587_v19 = vmul.f32 %v2887_v53, %v1573_v15  ;;  %v3218_v0 = vpop.f32.mrf.mxu1  ;;  %3227 = vmatpush3.xpose.msk.msra.mxu1 %vm604_vm0, %v1807_v29 }
 0x63c   : > { %3206 = vmatprep.mubr.msk.f32.mxu0 %vm604_vm0, %v1598_v17  ;;  %v1586_v2 = vmul.f32 %v2887_v53, %v1572_v20  ;;  %v1601_v23 = vadd.f32 %v2888_v58, %v1587_v19  ;;  %v1879_v38 = vpop.f32.mrf.mxu1 }
 0x63d   : > { %3207 = vmatmul.mubr.msk.f32.gmra.mxu0 %vm604_vm0, %v1599_v12  ;;  %3240 = vmatprep.subr.mxu0 %v1879_v38 }
 0x63e   : > { %v1600_v54 = vadd.f32 %v2888_v58, %v1586_v2  ;;  %v3225_v25 = vpop.f32.mrf.mxu1  ;;  %3241 = vmatpush3.msra.mxu0 %v1879_v38 }
 0x640   : > { %3209 = vmatprep.mubr.msk.f32.mxu0 %vm604_vm0, %v1600_v54 }
 0x641   : > { %3210 = vmatmul.mubr.msk.f32.gmra.mxu0 %vm604_vm0, %v1601_v23 }
 0x6f5   : > { %v3202_v26 = vpop.f32.mrf.mxu0 }
 0x6f7   : > { %v1696_v27 = vpop.f32.mrf.mxu0 }
 0x6f8   : > { %3228 = vmatprep.mubr.msk.f32.mxu1 %vm604_vm0, %v1696_v27 }
 0x6f9   : > { %v3205_v5 = vpop.f32.mrf.mxu0  ;;  %3229 = vmatmul.mubr.msk.f32.vlgmr.msra.gmra.mxu1 %vm604_vm0, %v3202_v26 }
 0x6fb   : > { %v1706_v31 = vpop.f32.mrf.mxu0 }
 0x6fc   : > { %3231 = vmatprep.mubr.msk.f32.mxu1 %vm604_vm0, %v1706_v31 }
 0x6fd   : > { %v3208_v32 = vpop.f32.mrf.mxu0  ;;  %3232 = vmatmul.mubr.msk.f32.gmra.mxu1 %vm604_vm0, %v3205_v5 }
 0x6ff   : > { %v1716_v1 = vpop.f32.mrf.mxu0 }
 0x700   : > { %3234 = vmatprep.mubr.msk.f32.mxu1 %vm604_vm0, %v1716_v1 }
 0x701   : > { %v3211_v34 = vpop.f32.mrf.mxu0  ;;  %3235 = vmatmul.mubr.msk.f32.gmra.mxu1 %vm604_vm0, %v3208_v32 }
 0x703   : > { %v1726_v35 = vpop.f32.mrf.mxu0 }
 0x704   : > { %3237 = vmatprep.mubr.msk.f32.mxu1 %vm604_vm0, %v1726_v35 }
 0x705   : > { %3238 = vmatmul.mubr.msk.f32.gmra.mxu1 %vm604_vm0, %v3211_v34 }
 0x7b9   : > { %v3230_v37 = vpop.f32.mrf.mxu1 }
 0x7ba   : > { %v2019_v39 = vsel %vm2015_vm4, %v3230_v37, -inf }
 0x7bb   : > { %2020 = vmax.xlane.f32.xlu1 %v2019_v39  ;;  %v1976_v41 = vpop.f32.mrf.mxu1 }
 0x7bc   : > { %v2016_v42 = vsel %vm2015_vm4, %v1976_v41, -inf }
 0x7bd   : > { %2017 = vmax.xlane.f32.xlu0 %v2016_v42  ;;  %v3233_v44 = vpop.f32.mrf.mxu1 }
 0x7be   : > { %v2025_v45 = vsel %vm2015_vm4, %v3233_v44, -inf }
 0x7bf   : > { %2026 = vmax.xlane.f32.xlu1 %v2025_v45  ;;  %v1986_v46 = vpop.f32.mrf.mxu1 }
 0x7c0   : > { %v2022_v47 = vsel %vm2015_vm4, %v1986_v46, -inf }
 0x7c1   : > { %2023 = vmax.xlane.f32.xlu0 %v2022_v47  ;;  %v3236_v50 = vpop.f32.mrf.mxu1 }
 0x7c2   : > { %v2031_v51 = vsel %vm2015_vm4, %v3236_v50, -inf }
 0x7c3   : > { %2032 = vmax.xlane.f32.xlu1 %v2031_v51  ;;  %v1996_v52 = vpop.f32.mrf.mxu1 }
 0x7c4   : > { %v2028_v53 = vsel %vm2015_vm4, %v1996_v52, -inf }
 0x7c5   : > { %2029 = vmax.xlane.f32.xlu0 %v2028_v53  ;;  %v3239_v55 = vpop.f32.mrf.mxu1 }
 0x7c6   : > { %v2037_v21 = vsel %vm2015_vm4, %v3239_v55, -inf }
 0x7c7   : > { %2038 = vmax.xlane.f32.xlu1 %v2037_v21  ;;  %v2006_v28 = vpop.f32.mrf.mxu1 }
 0x7c8   : > { %v2034_v56 = vsel %vm2015_vm4, %v2006_v28, -inf }
 0x7c9   : > { %2035 = vmax.xlane.f32.xlu0 %v2034_v56 }
 0x844   : > { %v2021_v57 = vpop.xlane.xlu1 %2020 }
 0x845   : > { %v2041_v58 = vsub.f32 %v3230_v37, %v2021_v57 }
 0x846   : > { %v2018_v59 = vpop.xlane.xlu0 %2017 }
 0x847   : > { %v2050_v62 = vmul.f32 1.442695, %v2041_v58  ;;  %v2040_v60 = vsub.f32 %v1976_v41, %v2018_v59 }
 0x848   : > { %v2027_v63 = vpop.xlane.xlu1 %2026 }
 0x849   : > { %3392 = vpow2.f32 %v2050_v62  ;;  %v2048_v3 = vmul.f32 1.442695, %v2040_v60  ;;  %v2043_v4 = vsub.f32 %v3233_v44, %v2027_v63 }
 0x84a   : > { %v2024_v40 = vpop.xlane.xlu0 %2023 }
 0x84b   : > { %3394 = vpow2.f32 %v2048_v3  ;;  %v2054_v30 = vmul.f32 1.442695, %v2043_v4  ;;  %v2042_v7 = vsub.f32 %v1986_v46, %v2024_v40 }
 0x84c   : > { %v2033_v33 = vpop.xlane.xlu1 %2032 }
 0x84d   : > { %3396 = vpow2.f32 %v2054_v30  ;;  %v2052_v10 = vmul.f32 1.442695, %v2042_v7  ;;  %v2045_v11 = vsub.f32 %v3236_v50, %v2033_v33 }
 0x84e   : > { %v2030_v14 = vpop.xlane.xlu0 %2029 }
 0x84f   : > { %3398 = vpow2.f32 %v2052_v10  ;;  %v2058_v61 = vmul.f32 1.442695, %v2045_v11  ;;  %v2044_v36 = vsub.f32 %v1996_v52, %v2030_v14 }
 0x850   : > { %v2039_v8 = vpop.xlane.xlu1 %2038 }
 0x851   : > { %3400 = vpow2.f32 %v2058_v61  ;;  %v2056_v43 = vmul.f32 1.442695, %v2044_v36  ;;  %v2047_v15 = vsub.f32 %v3239_v55, %v2039_v8 }
 0x852   : > { %v2036_v13 = vpop.xlane.xlu0 %2035 }
 0x853   : > { %3402 = vpow2.f32 %v2056_v43  ;;  %v2062_v17 = vmul.f32 1.442695, %v2047_v15  ;;  %v2046_v20 = vsub.f32 %v2006_v28, %v2036_v13 }
 0x855   : > { %3404 = vpow2.f32 %v2062_v17  ;;  %v2060_v12 = vmul.f32 1.442695, %v2046_v20 }
 0x856   : > { %v3393_v19 = vpop.eup %3392 }
 0x857   : > { %3406 = vpow2.f32 %v2060_v12  ;;  %v2067_v2 = vsel %vm2015_vm4, %v3393_v19, 0.0 }
 0x858   : > { %v3395_v54 = vpop.eup %3394  ;;  %2068 = vadd.xlane.f32.xlu1 %v2067_v2 }
 0x859   : > { %v2064_v23 = vsel %vm2015_vm4, %v3395_v54, 0.0 }
 0x85a   : > { %v3397_v29 = vpop.eup %3396  ;;  %2065 = vadd.xlane.f32.xlu0 %v2064_v23 }
 0x85b   : > { %v2073_v0 = vsel %vm2015_vm4, %v3397_v29, 0.0 }
 0x85c   : > { %v3399_v38 = vpop.eup %3398  ;;  %2074 = vadd.xlane.f32.xlu1 %v2073_v0 }
 0x85d   : > { %v2070_v25 = vsel %vm2015_vm4, %v3399_v38, 0.0 }
 0x85e   : > { %v3401_v26 = vpop.eup %3400  ;;  %2071 = vadd.xlane.f32.xlu0 %v2070_v25 }
 0x85f   : > { %v2079_v27 = vsel %vm2015_vm4, %v3401_v26, 0.0 }
 0x860   : > { %v3403_v5 = vpop.eup %3402  ;;  %2080 = vadd.xlane.f32.xlu1 %v2079_v27 }
 0x861   : > { %v2076_v31 = vsel %vm2015_vm4, %v3403_v5, 0.0 }
 0x862   : > { %v3405_v32 = vpop.eup %3404  ;;  %2077 = vadd.xlane.f32.xlu0 %v2076_v31 }
 0x863   : > { %v2085_v1 = vsel %vm2015_vm4, %v3405_v32, 0.0 }
 0x864   : > { %v3407_v34 = vpop.eup %3406  ;;  %2086 = vadd.xlane.f32.xlu1 %v2085_v1 }
 0x865   : > { %v2082_v35 = vsel %vm2015_vm4, %v3407_v34, 0.0 }
 0x866   : > { %2083 = vadd.xlane.f32.xlu0 %v2082_v35 }
 0x8e1   : > { %v2069_v37 = vpop.xlane.xlu1 %2068 }
 0x8e2   : > { %3408 = vrcp.f32 %v2069_v37 }
 0x8e3   : > { %v2066_v39 = vpop.xlane.xlu0 %2065 }
 0x8e4   : > { %3410 = vrcp.f32 %v2066_v39 }
 0x8e5   : > { %v2075_v41 = vpop.xlane.xlu1 %2074 }
 0x8e6   : > { %3412 = vrcp.f32 %v2075_v41 }
 0x8e7   : > { %v2072_v42 = vpop.xlane.xlu0 %2071 }
 0x8e8   : > { %3414 = vrcp.f32 %v2072_v42 }
 0x8e9   : > { %v2081_v44 = vpop.xlane.xlu1 %2080 }
 0x8ea   : > { %3416 = vrcp.f32 %v2081_v44 }
 0x8eb   : > { %v2078_v45 = vpop.xlane.xlu0 %2077 }
 0x8ec   : > { %3418 = vrcp.f32 %v2078_v45 }
 0x8ed   : > { %v2087_v46 = vpop.xlane.xlu1 %2086 }
 0x8ee   : > { %3420 = vrcp.f32 %v2087_v46 }
 0x8ef   : > { %v2084_v47 = vpop.xlane.xlu0 %2083  ;;  %v3409_v50 = vpop.eup %3408 }
 0x8f0   : > { %3422 = vrcp.f32 %v2084_v47  ;;  %v2091_v53 = vmul.f32 %v3409_v50, %v3393_v19 }
 0x8f1   : > { %v3411_v51 = vpop.eup %3410 }
 0x8f2   : > { %v2089_v52 = vmul.f32 %v3411_v51, %v3395_v54 }
 0x8f3   : > { %v3413_v55 = vpop.eup %3412 }
 0x8f4   : > { %3242 = vmatprep.mubr.msk.f32.mxu0 %vm2015_vm4, %v2089_v52  ;;  %v2095_v56 = vmul.f32 %v3413_v55, %v3397_v29 }
 0x8f5   : > { %v3415_v21 = vpop.eup %3414  ;;  %3243 = vmatmul.mubr.msk.f32.vlgmr.msra.gmra.mxu0 %vm2015_vm4, %v2091_v53 }
 0x8f6   : > { %v2093_v28 = vmul.f32 %v3415_v21, %v3399_v38 }
 0x8f7   : > { %v3417_v57 = vpop.eup %3416 }
 0x8f8   : > { %3245 = vmatprep.mubr.msk.f32.mxu0 %vm2015_vm4, %v2093_v28  ;;  %v2099_v62 = vmul.f32 %v3417_v57, %v3401_v26 }
 0x8f9   : > { %v3419_v58 = vpop.eup %3418  ;;  %3246 = vmatmul.mubr.msk.f32.gmra.mxu0 %vm2015_vm4, %v2095_v56 }
 0x8fa   : > { %v2097_v59 = vmul.f32 %v3419_v58, %v3403_v5 }
 0x8fb   : > { %v3421_v60 = vpop.eup %3420 }
 0x8fc   : > { %3248 = vmatprep.mubr.msk.f32.mxu0 %vm2015_vm4, %v2097_v59  ;;  %v2103_v4 = vmul.f32 %v3421_v60, %v3405_v32 }
 0x8fd   : > { %v3423_v63 = vpop.eup %3422  ;;  %3249 = vmatmul.mubr.msk.f32.gmra.mxu0 %vm2015_vm4, %v2099_v62 }
 0x8fe   : > { %v2101_v3 = vmul.f32 %v3423_v63, %v3407_v34 }
 0x900   : > { %3251 = vmatprep.mubr.msk.f32.mxu0 %vm2015_vm4, %v2101_v3 }
 0x901   : > { %3252 = vmatmul.mubr.msk.f32.gmra.mxu0 %vm2015_vm4, %v2103_v4 }
 0x9b5   : > { %v3244_v40 = vpop.f32.mrf.mxu0 }
 0x9b6   : > { %v3985_v30 = vadd.f32 %v3244_v40, %v3811_v6  ;;  %v2378_v40 = vld [vmem:[%s4261_s14 + $0x18] sm:$0xff] }
 0x9b7   : > { %v2194_v7 = vpop.f32.mrf.mxu0  ;;  %3254 = vmatprep.subr.mxu1 %v2378_v40 }
 0x9b8   : > { %v3988_v33 = vadd.f32 %v2194_v7, %v3814_v48  ;;  %v2246_v10 = vsel %vm604_vm0, %v3985_v30, 0.0  ;;  %v2377_v7 = vld [vmem:[%s4261_s14 + $0x10] sm:$0xff]  ;;  %3255 = vmatpush3.msra.mxu1 %v2378_v40 }
 0x9b9   : > { %2247 = vadd.xlane.f32.xlu1 %v2246_v10  ;;  %v3247_v11 = vpop.f32.mrf.mxu0  ;;  %v2376_v10 = vld [vmem:[%s4261_s14 + $0x8] sm:$0xff]  ;;  %3256 = vmatprep.subr.mxu1 %v2377_v7 }
 0x9ba   : > { %v3993_v14 = vadd.f32 %v3247_v11, %v3819_v49  ;;  %v2243_v61 = vsel %vm604_vm0, %v3988_v33, 0.0  ;;  %3257 = vmatpush3.msra.mxu1 %v2377_v7  ;;  %v2375_v11 = vld [vmem:[%s4261_s14] sm:$0xff] }
 0x9bb   : > { %2244 = vadd.xlane.f32.xlu0 %v2243_v61  ;;  %v2204_v36 = vpop.f32.mrf.mxu0  ;;  %3258 = vmatprep.subr.mxu1 %v2376_v10 }
 0x9bc   : > { %v3998_v6 = vadd.f32 %v2204_v36, %v3824_v9  ;;  %v2252_v48 = vsel %vm604_vm0, %v3993_v14, 0.0  ;;  %3259 = vmatpush3.msra.mxu1 %v2376_v10 }
 0x9bd   : > { %2253 = vadd.xlane.f32.xlu1 %v2252_v48  ;;  %v3250_v8 = vpop.f32.mrf.mxu0  ;;  %3260 = vmatprep.subr.mxu1 %v2375_v11 }
 0x9be   : > { %v4003_v43 = vadd.f32 %v3250_v8, %v3829_v16  ;;  %v2249_v49 = vsel %vm604_vm0, %v3998_v6, 0.0  ;;  %3261 = vmatpush3.msra.mxu1 %v2375_v11 }
 0x9bf   : > { %2250 = vadd.xlane.f32.xlu0 %v2249_v49  ;;  %v2214_v15 = vpop.f32.mrf.mxu0 }
 0x9c0   : > { %v4008_v13 = vadd.f32 %v2214_v15, %v3834_v18  ;;  %v2258_v9 = vsel %vm604_vm0, %v4003_v43, 0.0 }
 0x9c1   : > { %2259 = vadd.xlane.f32.xlu1 %v2258_v9  ;;  %v3253_v17 = vpop.f32.mrf.mxu0 }
 0x9c2   : > { %v4013_v20 = vadd.f32 %v3253_v17, %v3839_v22  ;;  %v2255_v16 = vsel %vm604_vm0, %v4008_v13, 0.0 }
 0x9c3   : > { %2256 = vadd.xlane.f32.xlu0 %v2255_v16  ;;  %v2224_v12 = vpop.f32.mrf.mxu0 }
 0x9c4   : > { %v4018_v19 = vadd.f32 %v2224_v12, %v3844_v24  ;;  %v2264_v18 = vsel %vm604_vm0, %v4013_v20, 0.0 }
 0x9c5   : > { %2265 = vadd.xlane.f32.xlu1 %v2264_v18 }
 0x9c6   : > { %v2261_v2 = vsel %vm604_vm0, %v4018_v19, 0.0 }
 0x9c7   : > { %2262 = vadd.xlane.f32.xlu0 %v2261_v2 }
 0xa42   : > { %v2248_v54 = vpop.xlane.xlu1 %2247 }
 0xa43   : > { %v2268_v23 = vmul.f32 0.03125, %v2248_v54 }
 0xa44   : > { %v2245_v22 = vpop.xlane.xlu0 %2244 }
 0xa45   : > { %v4025_v29 = vsub.f32 %v3985_v30, %v2268_v23  ;;  %v2267_v0 = vmul.f32 0.03125, %v2245_v22 }
 0xa46   : > { %v2254_v38 = vpop.xlane.xlu1 %2253 }
 0xa47   : > { %v4028_v25 = vsub.f32 %v3988_v33, %v2267_v0  ;;  %v2270_v24 = vmul.f32 0.03125, %v2254_v38  ;;  %v2284_v26 = vmul.f32 %v4025_v29, %v4025_v29 }
 0xa48   : > { %v2251_v27 = vpop.xlane.xlu0 %2250 }
 0xa49   : > { %v4033_v5 = vsub.f32 %v3993_v14, %v2270_v24  ;;  %v2269_v31 = vmul.f32 0.03125, %v2251_v27  ;;  %v2294_v32 = vsel %vm604_vm0, %v2284_v26, 0.0  ;;  %v2283_v1 = vmul.f32 %v4028_v25, %v4028_v25 }
 0xa4a   : > { %v2260_v34 = vpop.xlane.xlu1 %2259  ;;  %2295 = vadd.xlane.f32.xlu1 %v2294_v32 }
 0xa4b   : > { %v4039_v35 = vsub.f32 %v3998_v6, %v2269_v31  ;;  %v2272_v37 = vmul.f32 0.03125, %v2260_v34  ;;  %v2291_v39 = vsel %vm604_vm0, %v2283_v1, 0.0  ;;  %v2286_v41 = vmul.f32 %v4033_v5, %v4033_v5 }
 0xa4c   : > { %2292 = vadd.xlane.f32.xlu0 %v2291_v39  ;;  %v2257_v42 = vpop.xlane.xlu0 %2256  ;;  %v2916_v39 = vld [vmem:[%s4259_s12] ss:$0 sm:$0xff] }
 0xa4d   : > { %v4045_v44 = vsub.f32 %v4003_v43, %v2272_v37  ;;  %v2271_v45 = vmul.f32 0.03125, %v2257_v42  ;;  %v2300_v46 = vsel %vm604_vm0, %v2286_v41, 0.0  ;;  %v2285_v47 = vmul.f32 %v4039_v35, %v4039_v35 }
 0xa4e   : > { %2301 = vadd.xlane.f32.xlu1 %v2300_v46  ;;  %v2266_v50 = vpop.xlane.xlu1 %2265 }
 0xa4f   : > { %v4051_v51 = vsub.f32 %v4008_v13, %v2271_v45  ;;  %v2274_v52 = vmul.f32 0.03125, %v2266_v50  ;;  %v2297_v53 = vsel %vm604_vm0, %v2285_v47, 0.0  ;;  %v2288_v55 = vmul.f32 %v4045_v44, %v4045_v44  ;;  %v2917_v50 = vld [vmem:[%s4260_s13] ss:$0 sm:$0xff] }
 0xa50   : > { %2298 = vadd.xlane.f32.xlu0 %v2297_v53  ;;  %v2263_v21 = vpop.xlane.xlu0 %2262 }
 0xa51   : > { %v4057_v28 = vsub.f32 %v4013_v20, %v2274_v52  ;;  %v2273_v56 = vmul.f32 0.03125, %v2263_v21  ;;  %v2306_v57 = vsel %vm604_vm0, %v2288_v55, 0.0  ;;  %v2287_v58 = vmul.f32 %v4051_v51, %v4051_v51 }
 0xa52   : > { %2307 = vadd.xlane.f32.xlu1 %v2306_v57 }
 0xa53   : > { %v4063_v59 = vsub.f32 %v4018_v19, %v2273_v56  ;;  %v2303_v62 = vsel %vm604_vm0, %v2287_v58, 0.0  ;;  %v2290_v60 = vmul.f32 %v4057_v28, %v4057_v28 }
 0xa54   : > { %2304 = vadd.xlane.f32.xlu0 %v2303_v62 }
 0xa55   : > { %v2312_v63 = vsel %vm604_vm0, %v2290_v60, 0.0  ;;  %v2289_v3 = vmul.f32 %v4063_v59, %v4063_v59 }
 0xa56   : > { %2313 = vadd.xlane.f32.xlu1 %v2312_v63 }
 0xa57   : > { %v2309_v4 = vsel %vm604_vm0, %v2289_v3, 0.0 }
 0xa58   : > { %2310 = vadd.xlane.f32.xlu0 %v2309_v4 }
 0xad3   : > { %v2296_v61 = vpop.xlane.xlu1 %2295 }
 0xad4   : > { %v2316_v36 = vmul.f32 0.03125, %v2296_v61 }
 0xad5   : > { %v2293_v48 = vpop.xlane.xlu0 %2292 }
 0xad6   : > { %v2324_v8 = vadd.f32 1e-05, %v2316_v36  ;;  %v2315_v49 = vmul.f32 0.03125, %v2293_v48 }
 0xad7   : > { %v2302_v15 = vpop.xlane.xlu1 %2301 }
 0xad8   : > { %3424 = vrsqrt.f32 %v2324_v8  ;;  %v2323_v9 = vadd.f32 1e-05, %v2315_v49  ;;  %v2318_v17 = vmul.f32 0.03125, %v2302_v15  ;;  %v2596_v49 = vld [vmem:[%s4263_s16 + $0x48] sm:$0xff]  ;;  %v2595_v15 = vld [vmem:[%s4263_s16 + $0x40] sm:$0xff] }
 0xad9   : > { %v2299_v16 = vpop.xlane.xlu0 %2298 }
 0xada   : > { %3426 = vrsqrt.f32 %v2323_v9  ;;  %v2326_v12 = vadd.f32 1e-05, %v2318_v17  ;;  %v2317_v18 = vmul.f32 0.03125, %v2299_v16  ;;  %v2594_v9 = vld [vmem:[%s4263_s16 + $0x38] sm:$0xff]  ;;  %v2593_v17 = vld [vmem:[%s4263_s16 + $0x30] sm:$0xff]  ;;  %v2592_v16 = vld [vmem:[%s4263_s16 + $0x28] sm:$0xff] }
 0xadb   : > { %v2308_v2 = vpop.xlane.xlu1 %2307 }
 0xadc   : > { %3428 = vrsqrt.f32 %v2326_v12  ;;  %v2325_v54 = vadd.f32 1e-05, %v2317_v18  ;;  %v2320_v23 = vmul.f32 0.03125, %v2308_v2  ;;  %v2591_v12 = vld [vmem:[%s4263_s16 + $0x20] sm:$0xff]  ;;  %v2590_v18 = vld [vmem:[%s4263_s16 + $0x18] sm:$0xff]  ;;  %v2589_v2 = vld [vmem:[%s4263_s16 + $0x10] sm:$0xff] }
 0xadd   : > { %v2305_v22 = vpop.xlane.xlu0 %2304 }
 0xade   : > { %3430 = vrsqrt.f32 %v2325_v54  ;;  %v2328_v0 = vadd.f32 1e-05, %v2320_v23  ;;  %v2319_v38 = vmul.f32 0.03125, %v2305_v22  ;;  %v2588_v54 = vld [vmem:[%s4263_s16 + $0x8] sm:$0xff]  ;;  %v2587_v23 = vld [vmem:[%s4263_s16] sm:$0xff] }
 0xadf   : > { %v2314_v24 = vpop.xlane.xlu1 %2313  ;;  %v2918_v22 = vld [vmem:[%s4262_s15] ss:$0 sm:$0xff] }
 0xae0   : > { %3432 = vrsqrt.f32 %v2328_v0  ;;  %v2327_v26 = vadd.f32 1e-05, %v2319_v38  ;;  %v2322_v27 = vmul.f32 0.03125, %v2314_v24 }
 0xae1   : > { %v2311_v31 = vpop.xlane.xlu0 %2310 }
 0xae2   : > { %3434 = vrsqrt.f32 %v2327_v26  ;;  %v2330_v32 = vadd.f32 1e-05, %v2322_v27  ;;  %v2321_v1 = vmul.f32 0.03125, %v2311_v31 }
 0xae4   : > { %3436 = vrsqrt.f32 %v2330_v32  ;;  %v2329_v34 = vadd.f32 1e-05, %v2321_v1 }
 0xae5   : > { %v3425_v37 = vpop.eup %3424 }
 0xae6   : > { %v2340_v41 = vmul.f32 %v3425_v37, %v4025_v29  ;;  %3438 = vrsqrt.f32 %v2329_v34 }
 0xae7   : > { %v3427_v42 = vpop.eup %3426 }
 0xae8   : > { %v2339_v45 = vmul.f32 %v3427_v42, %v4028_v25  ;;  %v2354_v47 = vmul.f32 %v2916_v39, %v2340_v41 }
 0xae9   : > { %v3429_v46 = vpop.eup %3428 }
 0xaea   : > { %v2353_v52 = vmul.f32 %v2916_v39, %v2339_v45  ;;  %v2342_v53 = vmul.f32 %v3429_v46, %v4033_v5  ;;  %v2368_v58 = vadd.f32 %v2917_v50, %v2354_v47 }
 0xaeb   : > { %v3431_v55 = vpop.eup %3430 }
 0xaec   : > { %v2367_v21 = vadd.f32 %v2917_v50, %v2353_v52  ;;  %v2341_v56 = vmul.f32 %v3431_v55, %v4039_v35  ;;  %v2356_v29 = vmul.f32 %v2916_v39, %v2342_v53 }
 0xaed   : > { %v3433_v57 = vpop.eup %3432 }
 0xaee   : > { %3262 = vmatprep.mubr.msk.f32.mxu1 %vm604_vm0, %v2367_v21  ;;  %v2355_v62 = vmul.f32 %v2916_v39, %v2341_v56  ;;  %v2344_v25 = vmul.f32 %v3433_v57, %v4045_v44  ;;  %v2370_v5 = vadd.f32 %v2917_v50, %v2356_v29 }
 0xaef   : > { %v3435_v60 = vpop.eup %3434  ;;  %3263 = vmatmul.mubr.msk.f32.vlgmr.msra.gmra.mxu1 %vm604_vm0, %v2368_v58 }
 0xaf0   : > { %v2369_v63 = vadd.f32 %v2917_v50, %v2355_v62  ;;  %v2343_v3 = vmul.f32 %v3435_v60, %v4051_v51  ;;  %v2358_v40 = vmul.f32 %v2916_v39, %v2344_v25 }
 0xaf1   : > { %v3437_v4 = vpop.eup %3436 }
 0xaf2   : > { %3265 = vmatprep.mubr.msk.f32.mxu1 %vm604_vm0, %v2369_v63  ;;  %v2357_v35 = vmul.f32 %v2916_v39, %v2343_v3  ;;  %v2346_v7 = vmul.f32 %v3437_v4, %v4057_v28  ;;  %v2372_v61 = vadd.f32 %v2917_v50, %v2358_v40  ;;  %v2598_v28 = vld [vmem:[%s4263_s16 + $0x58] sm:$0xff] }
 0xaf3   : > { %v3439_v10 = vpop.eup %3438  ;;  %3266 = vmatmul.mubr.msk.f32.gmra.mxu1 %vm604_vm0, %v2370_v5  ;;  %3274 = vmatprep.subr.mxu0 %v2598_v28 }
 0xaf4   : > { %v2371_v11 = vadd.f32 %v2917_v50, %v2357_v35  ;;  %v2345_v44 = vmul.f32 %v3439_v10, %v4063_v59  ;;  %v2360_v36 = vmul.f32 %v2916_v39, %v2346_v7  ;;  %3275 = vmatpush3.msra.mxu0 %v2598_v28  ;;  %v2597_v59 = vld [vmem:[%s4263_s16 + $0x50] sm:$0xff] }
 0xaf5   : > { %3276 = vmatprep.subr.mxu0 %v2597_v59 }
 0xaf6   : > { %3268 = vmatprep.mubr.msk.f32.mxu1 %vm604_vm0, %v2371_v11  ;;  %v2359_v48 = vmul.f32 %v2916_v39, %v2345_v44  ;;  %v2374_v8 = vadd.f32 %v2917_v50, %v2360_v36  ;;  %3277 = vmatpush3.msra.mxu0 %v2597_v59 }
 0xaf7   : > { %3269 = vmatmul.mubr.msk.f32.gmra.mxu1 %vm604_vm0, %v2372_v61  ;;  %3278 = vmatprep.subr.mxu0 %v2596_v49 }
 0xaf8   : > { %v2373_v51 = vadd.f32 %v2917_v50, %v2359_v48  ;;  %3279 = vmatpush3.msra.mxu0 %v2596_v49 }
 0xaf9   : > { %3280 = vmatprep.subr.mxu0 %v2595_v15 }
 0xafa   : > { %3271 = vmatprep.mubr.msk.f32.mxu1 %vm604_vm0, %v2373_v51  ;;  %3281 = vmatpush3.msra.mxu0 %v2595_v15 }
 0xafb   : > { %3272 = vmatmul.mubr.msk.f32.gmra.mxu1 %vm604_vm0, %v2374_v8  ;;  %3282 = vmatprep.subr.mxu0 %v2594_v9 }
 0xafc   : > { %3283 = vmatpush3.msra.mxu0 %v2594_v9 }
 0xafd   : > { %3284 = vmatprep.subr.mxu0 %v2593_v17 }
 0xafe   : > { %3285 = vmatpush3.msra.mxu0 %v2593_v17 }
 0xaff   : > { %3286 = vmatprep.subr.mxu0 %v2592_v16 }
 0xb00   : > { %3287 = vmatpush3.msra.mxu0 %v2592_v16 }
 0xb01   : > { %3288 = vmatprep.subr.mxu0 %v2591_v12 }
 0xb02   : > { %3289 = vmatpush3.msra.mxu0 %v2591_v12 }
 0xb03   : > { %3290 = vmatprep.subr.mxu0 %v2590_v18 }
 0xb04   : > { %3291 = vmatpush3.msra.mxu0 %v2590_v18 }
 0xb05   : > { %3292 = vmatprep.subr.mxu0 %v2589_v2 }
 0xb06   : > { %3293 = vmatpush3.msra.mxu0 %v2589_v2 }
 0xb07   : > { %3294 = vmatprep.subr.mxu0 %v2588_v54 }
 0xb08   : > { %3295 = vmatpush3.msra.mxu0 %v2588_v54 }
 0xb09   : > { %3296 = vmatprep.subr.mxu0 %v2587_v23 }
 0xb0a   : > { %3297 = vmatpush3.msra.mxu0 %v2587_v23 }
 0xbaf   : > { %v3264_v0 = vpop.f32.mrf.mxu1 }
 0xbb0   : > { %v4145_v38 = vadd.f32 %v3264_v0, %v2918_v22 }
 0xbb1   : > { %v2476_v24 = vpop.f32.mrf.mxu1 }
 0xbb2   : > { %v2516_v26 = vmul.f32 %v4145_v38, %v4145_v38  ;;  %v4149_v27 = vadd.f32 %v2918_v22, %v2476_v24 }
 0xbb3   : > { %v3267_v31 = vpop.f32.mrf.mxu1 }
 0xbb4   : > { %v2524_v32 = vmul.f32 %v2516_v26, %v4145_v38  ;;  %v2515_v1 = vmul.f32 %v4149_v27, %v4149_v27  ;;  %v4154_v34 = vadd.f32 %v3267_v31, %v2918_v22 }
 0xbb5   : > { %v2486_v37 = vpop.f32.mrf.mxu1 }
 0xbb6   : > { %v2532_v39 = vmul.f32 0.044715, %v2524_v32  ;;  %v2523_v41 = vmul.f32 %v2515_v1, %v4149_v27  ;;  %v2518_v42 = vmul.f32 %v4154_v34, %v4154_v34  ;;  %v4159_v45 = vadd.f32 %v2918_v22, %v2486_v37 }
 0xbb7   : > { %v3270_v46 = vpop.f32.mrf.mxu1 }
 0xbb8   : > { %v2540_v47 = vadd.f32 %v2532_v39, %v4145_v38  ;;  %v2531_v50 = vmul.f32 0.044715, %v2523_v41  ;;  %v2526_v52 = vmul.f32 %v2518_v42, %v4154_v34  ;;  %v2517_v53 = vmul.f32 %v4159_v45, %v4159_v45 }
 0xbb9   : > { %v4165_v55 = vadd.f32 %v3270_v46, %v2918_v22  ;;  %v2496_v21 = vpop.f32.mrf.mxu1 }
 0xbba   : > { %v2548_v56 = vmul.f32 0.7978846, %v2540_v47  ;;  %v2539_v57 = vadd.f32 %v2531_v50, %v4149_v27  ;;  %v2534_v58 = vmul.f32 0.044715, %v2526_v52  ;;  %v2525_v29 = vmul.f32 %v2517_v53, %v4159_v45 }
 0xbbb   : > { %v2520_v62 = vmul.f32 %v4165_v55, %v4165_v55  ;;  %v4171_v25 = vadd.f32 %v2918_v22, %v2496_v21  ;;  %v3273_v60 = vpop.f32.mrf.mxu1 }
 0xbbc   : > { %3440 = vtanh.f32 %v2548_v56  ;;  %v2547_v63 = vmul.f32 0.7978846, %v2539_v57  ;;  %v2542_v3 = vadd.f32 %v2534_v58, %v4154_v34  ;;  %v2533_v4 = vmul.f32 0.044715, %v2525_v29 }
 0xbbd   : > { %v2528_v5 = vmul.f32 %v2520_v62, %v4165_v55  ;;  %v2519_v40 = vmul.f32 %v4171_v25, %v4171_v25  ;;  %v4177_v35 = vadd.f32 %v3273_v60, %v2918_v22  ;;  %v2506_v7 = vpop.f32.mrf.mxu1 }
 0xbbe   : > { %3442 = vtanh.f32 %v2547_v63  ;;  %v2550_v10 = vmul.f32 0.7978846, %v2542_v3  ;;  %v2541_v11 = vadd.f32 %v2533_v4, %v4159_v45  ;;  %v2507_v44 = vadd.f32 %v2918_v22, %v2506_v7 }
 0xbbf   : > { %v2536_v61 = vmul.f32 0.044715, %v2528_v5  ;;  %v2527_v36 = vmul.f32 %v2519_v40, %v4171_v25  ;;  %v2522_v48 = vmul.f32 %v4177_v35, %v4177_v35 }
 0xbc0   : > { %3444 = vtanh.f32 %v2550_v10  ;;  %v2549_v51 = vmul.f32 0.7978846, %v2541_v11  ;;  %v2521_v8 = vmul.f32 %v2507_v44, %v2507_v44 }
 0xbc1   : > { %v2544_v28 = vadd.f32 %v2536_v61, %v4165_v55  ;;  %v2535_v59 = vmul.f32 0.044715, %v2527_v36  ;;  %v2530_v49 = vmul.f32 %v2522_v48, %v4177_v35 }
 0xbc2   : > { %3446 = vtanh.f32 %v2549_v51  ;;  %v2529_v15 = vmul.f32 %v2521_v8, %v2507_v44 }
 0xbc3   : > { %v2552_v9 = vmul.f32 0.7978846, %v2544_v28  ;;  %v2543_v17 = vadd.f32 %v2535_v59, %v4171_v25  ;;  %v2538_v16 = vmul.f32 0.044715, %v2530_v49 }
 0xbc4   : > { %v2537_v12 = vmul.f32 0.044715, %v2529_v15 }
 0xbc5   : > { %3448 = vtanh.f32 %v2552_v9  ;;  %v2551_v18 = vmul.f32 0.7978846, %v2543_v17  ;;  %v2546_v2 = vadd.f32 %v2538_v16, %v4177_v35  ;;  %v3458_v9 = vld [vmem:[%s3585_s1 + $0x18] sm:$0xff] }
 0xbc6   : > { %v2545_v54 = vadd.f32 %v2537_v12, %v2507_v44 }
 0xbc7   : > { %3450 = vtanh.f32 %v2551_v18  ;;  %v2554_v23 = vmul.f32 0.7978846, %v2546_v2  ;;  %v3459_v18 = vld [vmem:[%s3585_s1 + $0x10] sm:$0xff] }
 0xbc8   : > { %v2553_v22 = vmul.f32 0.7978846, %v2545_v54 }
 0xbc9   : > { %v3441_v0 = vpop.eup %3440  ;;  %3452 = vtanh.f32 %v2554_v23 }
 0xbca   : > { %v2564_v24 = vadd.f32 1.0, %v3441_v0  ;;  %3454 = vtanh.f32 %v2553_v22 }
 0xbcb   : > { %v3443_v26 = vpop.eup %3442 }
 0xbcc   : > { %v2563_v31 = vadd.f32 1.0, %v3443_v26  ;;  %v2572_v1 = vmul.f32 0.5, %v2564_v24 }
 0xbcd   : > { %v3445_v32 = vpop.eup %3444 }
 0xbce   : > { %v2571_v37 = vmul.f32 0.5, %v2563_v31  ;;  %v2566_v39 = vadd.f32 1.0, %v3445_v32  ;;  %v2580_v47 = vmul.f32 %v2572_v1, %v4145_v38  ;;  %v3461_v32 = vld [vmem:[%s3585_s1 + $0x20] sm:$0xff] }
 0xbcf   : > { %v3447_v41 = vpop.eup %3446 }
 0xbd0   : > { %v2579_v42 = vmul.f32 %v2571_v37, %v4149_v27  ;;  %v2565_v46 = vadd.f32 1.0, %v3447_v41  ;;  %v2574_v50 = vmul.f32 0.5, %v2566_v39  ;;  %v3462_v39 = vld [vmem:[%s3585_s1 + $0x38] sm:$0xff] }
 0xbd2   : > { %v3449_v52 = vpop.eup %3448  ;;  %3298 = vmatprep.mubr.msk.f32.mxu0 %vm2606_vm5, %v2579_v42  ;;  %v2573_v53 = vmul.f32 0.5, %v2565_v46  ;;  %v2582_v58 = vmul.f32 %v2574_v50, %v4154_v34  ;;  %v3463_v46 = vld [vmem:[%s3585_s1 + $0x30] sm:$0xff] }
 0xbd3   : > { %3299 = vmatmul.mubr.msk.f32.vlgmr.msra.gmra.mxu0 %vm2606_vm5, %v2580_v47  ;;  %v2568_v21 = vadd.f32 1.0, %v3449_v52 }
 0xbd4   : > { %v3451_v56 = vpop.eup %3450  ;;  %v2581_v57 = vmul.f32 %v2573_v53, %v4159_v45 }
 0xbd5   : > { %v2567_v29 = vadd.f32 1.0, %v3451_v56  ;;  %v2576_v27 = vmul.f32 0.5, %v2568_v21 }
 0xbd6   : > { %v3453_v62 = vpop.eup %3452  ;;  %3301 = vmatprep.mubr.msk.f32.mxu0 %vm2606_vm5, %v2581_v57 }
 0xbd7   : > { %v3455_v60 = vpop.eup %3454  ;;  %3302 = vmatmul.mubr.msk.f32.gmra.mxu0 %vm2606_vm5, %v2582_v58  ;;  %v2575_v38 = vmul.f32 0.5, %v2567_v29  ;;  %v2570_v63 = vadd.f32 1.0, %v3453_v62  ;;  %v2584_v5 = vmul.f32 %v2576_v27, %v4165_v55 }
 0xbd8   : > { %v2569_v3 = vadd.f32 1.0, %v3455_v60 }
 0xbd9   : > { %v2583_v4 = vmul.f32 %v2575_v38, %v4171_v25  ;;  %v2578_v45 = vmul.f32 0.5, %v2570_v63  ;;  %v2927_v25 = vld [vmem:[%s4264_s17] ss:$0 sm:$0xff] }
 0xbda   : > { %v2577_v40 = vmul.f32 0.5, %v2569_v3 }
 0xbdb   : > { %3304 = vmatprep.mubr.msk.f32.mxu0 %vm2606_vm5, %v2583_v4  ;;  %v2586_v7 = vmul.f32 %v2578_v45, %v4177_v35 }
 0xbdc   : > { %3305 = vmatmul.mubr.msk.f32.gmra.mxu0 %vm2606_vm5, %v2584_v5  ;;  %v2585_v34 = vmul.f32 %v2577_v40, %v2507_v44  ;;  %v3456_v44 = vld [vmem:[%s3585_s1 + $0x8] sm:$0xff] }
 0xbde   : > { %3307 = vmatprep.mubr.msk.f32.mxu0 %vm2606_vm5, %v2585_v34 }
 0xbe0   : > { %3308 = vmatmul.mubr.msk.f32.gmra.mxu0 %vm2606_vm5, %v2586_v7 }
 0xc93   : > { %v3300_v55 = vpop.f32.mrf.mxu0 }
 0xc94   : > { %v2703_v10 = vadd.f32 %v3300_v55, %v2927_v25 }
 0xc95   : > { %v2697_v11 = vpop.f32.mrf.mxu0 }
 0xc96   : > { %v2737_v61 = vadd.f32 %v2703_v10, %v3985_v30  ;;  %v2698_v36 = vadd.f32 %v2927_v25, %v2697_v11  ;;  %v3457_v30 = vld [vmem:[%s3585_s1] sm:$0xff] }
 0xc97   : > { %v3303_v35 = vpop.f32.mrf.mxu0 }
 0xc98   : > { %v2745_v48 = vadd.f32 %v3456_v44, %v2737_v61  ;;  %v2736_v51 = vadd.f32 %v2698_v36, %v3988_v33  ;;  %v2713_v8 = vadd.f32 %v3303_v35, %v2927_v25 }
 0xc99   : > { %v2707_v28 = vpop.f32.mrf.mxu0 }
 0xc9a   : > { %2753 = vst.msk [vmem:[%s4211_s20 + $0x8] sm:$0xff] %vm604_vm0, %v2745_v48  ;;  %v2744_v59 = vadd.f32 %v3457_v30, %v2736_v51  ;;  %v2739_v49 = vadd.f32 %v2713_v8, %v3993_v14  ;;  %v2708_v15 = vadd.f32 %v2927_v25, %v2707_v28 }
 0xc9c   : > { %2752 = vst.msk [vmem:[%s4211_s20] sm:$0xff] %vm604_vm0, %v2744_v59  ;;  %v2747_v17 = vadd.f32 %v3458_v9, %v2739_v49  ;;  %v2738_v16 = vadd.f32 %v2708_v15, %v3998_v6  ;;  %v3306_v12 = vpop.f32.mrf.mxu0  ;;  %v3460_v6 = vld [vmem:[%s3585_s1 + $0x28] sm:$0xff] }
 0xc9d   : > { %v2723_v33 = vadd.f32 %v3306_v12, %v2927_v25 }
 0xc9e   : > { %2755 = vst.msk [vmem:[%s4211_s20 + $0x18] sm:$0xff] %vm604_vm0, %v2747_v17  ;;  %v2746_v2 = vadd.f32 %v3459_v18, %v2738_v16  ;;  %v2717_v54 = vpop.f32.mrf.mxu0 }
 0xc9f   : > { %v2741_v14 = vadd.f32 %v2723_v33, %v4003_v43  ;;  %v2718_v23 = vadd.f32 %v2927_v25, %v2717_v54 }
 0xca0   : > { %2754 = vst.msk [vmem:[%s4211_s20 + $0x10] sm:$0xff] %vm604_vm0, %v2746_v2  ;;  %v3309_v22 = vpop.f32.mrf.mxu0 }
 0xca1   : > { %v2749_v0 = vadd.f32 %v3460_v6, %v2741_v14  ;;  %v2740_v24 = vadd.f32 %v2718_v23, %v4008_v13  ;;  %v2733_v26 = vadd.f32 %v3309_v22, %v2927_v25 }
 0xca2   : > { %v2727_v31 = vpop.f32.mrf.mxu0 }
 0xca3   : > { %2757 = vst.msk [vmem:[%s4211_s20 + $0x28] sm:$0xff] %vm604_vm0, %v2749_v0  ;;  %v2748_v1 = vadd.f32 %v3461_v32, %v2740_v24  ;;  %v2743_v37 = vadd.f32 %v2733_v26, %v4013_v20  ;;  %v2728_v43 = vadd.f32 %v2927_v25, %v2727_v31 }
 0xca5   : > { %2756 = vst.msk [vmem:[%s4211_s20 + $0x20] sm:$0xff] %vm604_vm0, %v2748_v1  ;;  %v2751_v41 = vadd.f32 %v3462_v39, %v2743_v37  ;;  %v2742_v42 = vadd.f32 %v2728_v43, %v4018_v19 }
 0xca7   : > { %2759 = vst.msk [vmem:[%s4211_s20 + $0x38] sm:$0xff] %vm604_vm0, %v2751_v41  ;;  %v2750_v47 = vadd.f32 %v3463_v46, %v2742_v42 }
 0xca9   : > { %2758 = vst.msk [vmem:[%s4211_s20 + $0x30] sm:$0xff] %vm604_vm0, %v2750_v47 }
 0xcaa PF: > { %s28_s27 = sadd.s32 1, %s3470_s27  }
 0xcab   : > { %p25_p4 = scmp.ge.s32.totalorder %s28_s27, 4  }
 0xcad   :  { %27 = sbr.rel (!%p25_p4) target bundleno = 4 (0x4), region = 125 }

</bundles_post_ra>
